<compile_context>
chip_gen: v7x
topology: tpu7x:2x2x1
jax: 0.10.0
libtpu: 0.0.40
codegen_flags: <defaults>
</compile_context>

<pallas_src>
import functools

import jax
import jax.numpy as jnp
from jax.experimental import pallas as pl
from jax.experimental.pallas import tpu as pltpu


# ---------------------------------------------------------------------------
# Fused kernel: qkv -> multi-head attention -> proj, all in one program
# ---------------------------------------------------------------------------
def _fused_attn_kernel(x_ref, wqkv_ref, bqkv_ref, wproj_ref, bproj_ref, o_ref,
                       *, num_heads, compute_dtype):
    # x_ref:     (B, N, C)       whole batch (single grid step)
    # wqkv_ref:  (3, H, C, Dh)   per-head q/k/v weights, q pre-scaled
    # bqkv_ref:  (3, H, 1, Dh)   f32, q pre-scaled
    # wproj_ref: (H, Dh, C)      per-head slices of Wproj^T
    # bproj_ref: (1, 1, C)       f32
    # o_ref:     (B, N, C)
    bsz, n, c = x_ref.shape
    h = num_heads
    dh = c // h
    grp = bsz * h                                   # group = (batch, head)

    # Broadcast x over heads once (hoisted): (B, N, C) -> (B*H, N, C).
    x = x_ref[...]
    xg = jnp.broadcast_to(x[:, None, :, :], (bsz, h, n, c))
    xg = xg.reshape(grp, n, c).astype(compute_dtype)

    def per_group(arr):                             # (H, a, b) -> (B*H, a, b)
        return jnp.broadcast_to(arr[None], (bsz,) + arr.shape).reshape(
            (grp,) + arr.shape[1:])

    # q/k/v projections, batched over the group axis, f32 MXU accumulation.
    # The softmax scale is already folded into the q weights/bias.
    q = jnp.einsum("gnc,gcd->gnd", xg, per_group(wqkv_ref[0]),
                   preferred_element_type=jnp.float32) + per_group(bqkv_ref[0])
    k = jnp.einsum("gnc,gcd->gnd", xg, per_group(wqkv_ref[1]),
                   preferred_element_type=jnp.float32) + per_group(bqkv_ref[1])
    v = jnp.einsum("gnc,gcd->gnd", xg, per_group(wqkv_ref[2]),
                   preferred_element_type=jnp.float32) + per_group(bqkv_ref[2])

    # Attention: MXU operands in compute_dtype, softmax math in f32.
    # TODO(synk): for large N switch this to a kv-tiled online-softmax (flash)
    # loop so the (G, N, N) scores stay bounded (mandatory first on v7x's
    # 64 MiB per-TC VMEM).
    s = jnp.einsum("gqd,gkd->gqk",
                   q.astype(compute_dtype), k.astype(compute_dtype),
                   preferred_element_type=jnp.float32)           # (G, N, N)
    m = jnp.max(s, axis=-1, keepdims=True)
    p = jnp.exp(s - m)
    l = jnp.sum(p, axis=-1, keepdims=True)                       # (G, N, 1)
    acc = jnp.einsum("gqk,gkd->gqd",
                     p.astype(compute_dtype), v.astype(compute_dtype),
                     preferred_element_type=jnp.float32)         # (G, N, Dh)
    acc = acc * pl.reciprocal(l, approx=True)                    # EUP vrcp

    # Output projection per head + sum over the (untiled) head axis.  This
    # replaces the (B,H,N,Dh) -> (B,N,H*Dh) transpose/concat of the naive
    # layout with plain tile adds.
    wpg = per_group(wproj_ref[...])                              # (G, Dh, C)
    t = jnp.einsum("gnd,gdc->gnc", acc.astype(compute_dtype), wpg,
                   preferred_element_type=jnp.float32)           # (G, N, C)
    out = jnp.sum(t.reshape(bsz, h, n, c), axis=1) + bproj_ref[...]
    # TODO(synk): at larger N*C, present the output as a lane-dense (B, N*C)
    # slab (wrapper-side reshape) to avoid masked vst on a 32-wide last dim.
    o_ref[...] = out.astype(o_ref.dtype)


# ---------------------------------------------------------------------------
# One-time parameter preparation (outside the hot path)
# ---------------------------------------------------------------------------
def prepare_params(params, num_heads, qk_scale=None, param_dtype=jnp.bfloat16):
    """Transpose / head-split the weights and fold the softmax scale into the
    q slice (folding happens in f32, before any low-precision rounding)."""
    w_qkv = jnp.asarray(params["w_qkv"], jnp.float32)    # (3C, C) torch layout
    b_qkv = jnp.asarray(params["b_qkv"], jnp.float32)    # (3C,)
    w_proj = jnp.asarray(params["w_proj"], jnp.float32)  # (C, C)
    b_proj = jnp.asarray(params["b_proj"], jnp.float32)  # (C,)

    c = w_proj.shape[0]
    h = num_heads
    assert c % h == 0
    dh = c // h
    scale = qk_scale if qk_scale is not None else dh ** (-0.5)
    qkv_scale = jnp.array([scale, 1.0, 1.0], jnp.float32).reshape(3, 1, 1, 1)

    # Wqkv (3C, C) -> Wqkv^T (C, 3C) -> (C, 3, H, Dh) -> (3, H, C, Dh)
    w3 = jnp.transpose(w_qkv.T.reshape(c, 3, h, dh), (1, 2, 0, 3)) * qkv_scale
    b3 = b_qkv.reshape(3, h, 1, dh) * qkv_scale
    # Wproj^T split per head: (C, C) -> (H, Dh, C)
    wp = w_proj.T.reshape(h, dh, c)
    bp = b_proj.reshape(1, 1, c)

    # Weights in param_dtype (bf16 feeds the MXU at full rate on v6e/v7x);
    # biases stay f32 (added to f32 accumulators; v5e has no bf16 VPU/EUP).
    return (w3.astype(param_dtype), b3, wp.astype(param_dtype), bp)


# ---------------------------------------------------------------------------
# Forward pass: grid-less pallas_call (single step, everything VMEM-resident)
# ---------------------------------------------------------------------------
def attention_forward(x, prepared, num_heads, compute_dtype=jnp.bfloat16):
    B, N, C = x.shape
    w_qkv, b_qkv, w_proj, b_proj = prepared
    kernel = functools.partial(_fused_attn_kernel, num_heads=num_heads,
                               compute_dtype=compute_dtype)
    # TODO(synk): for large B*N reintroduce a grid over row tiles with a
    # flash-style "arbitrary" kv axis, budget vmem_limit_bytes from the (N,N)
    # scores, and give the constant weight specs pipeline_mode=pl.Buffered(1)
    # so they are not double-buffered (matters on v7x's 64 MiB per-TC VMEM).
    return pl.pallas_call(
        kernel,
        out_shape=jax.ShapeDtypeStruct((B, N, C), x.dtype),
        in_specs=[pl.BlockSpec(memory_space=pltpu.MemorySpace.VMEM)] * 5,
        out_specs=pl.BlockSpec(memory_space=pltpu.MemorySpace.VMEM),
        compiler_params=pltpu.CompilerParams(
            vmem_limit_bytes=32 * 1024 * 1024),
    )(x, w_qkv, b_qkv, w_proj, b_proj)


# ---------------------------------------------------------------------------
# Pure-JAX reference (mirrors the PyTorch module exactly, unmodified params)
# ---------------------------------------------------------------------------
def attention_reference(x, params, num_heads, qk_scale=None):
    B, N, C = x.shape
    head_dim = C // num_heads
    scale = qk_scale if qk_scale is not None else head_dim ** (-0.5)
    qkv = x @ params["w_qkv"].T + params["b_qkv"]
    qkv = qkv.reshape(B, N, 3, num_heads, head_dim).transpose(2, 0, 3, 1, 4)
    q, k, v = qkv[0] * scale, qkv[1], qkv[2]
    attn = jax.nn.softmax(q @ jnp.swapaxes(k, -1, -2), axis=-1)
    o = (attn @ v).transpose(0, 2, 1, 3).reshape(B, N, C)
    return o @ params["w_proj"].T + params["b_proj"]


if __name__ == "__main__":
    # Small shapes consistent with the module: dim=32, num_heads=8 -> head_dim=4.
    B, N, C, H = 2, 8, 32, 8

    key = jax.random.PRNGKey(0)
    kx, kwq, kbq, kwp, kbp = jax.random.split(key, 5)

    x = jax.random.normal(kx, (B, N, C), dtype=jnp.float32)
    params = {
        "w_qkv":  0.1 * jax.random.normal(kwq, (3 * C, C), dtype=jnp.float32),
        "b_qkv":  0.1 * jax.random.normal(kbq, (3 * C,), dtype=jnp.float32),
        "w_proj": 0.1 * jax.random.normal(kwp, (C, C), dtype=jnp.float32),
        "b_proj": 0.1 * jax.random.normal(kbp, (C,), dtype=jnp.float32),
    }

    ref = attention_reference(x, params, num_heads=H)

    # f32 compute path: tight correctness check.
    prep_f32 = prepare_params(params, num_heads=H, param_dtype=jnp.float32)
    out_f32 = attention_forward(x, prep_f32, num_heads=H,
                                compute_dtype=jnp.float32)
    out_f32 = jax.block_until_ready(out_f32)
    assert out_f32.shape == (B, N, C)
    assert jnp.allclose(out_f32, ref, atol=5e-3, rtol=5e-3), \
        float(jnp.max(jnp.abs(out_f32 - ref)))

    # bf16 MXU-operand path (v6e/v7x feedback): softmax stays f32, looser tol.
    prep_bf16 = prepare_params(params, num_heads=H, param_dtype=jnp.bfloat16)
    out_bf16 = attention_forward(x, prep_bf16, num_heads=H,
                                 compute_dtype=jnp.bfloat16)
    out_bf16 = jax.block_until_ready(out_bf16)
    assert out_bf16.shape == (B, N, C)
    assert jnp.allclose(out_bf16, ref, atol=1e-1, rtol=1e-1), \
        float(jnp.max(jnp.abs(out_bf16 - ref)))

    print("KERNEL_OK")
</pallas_src>

<mosaic_0001>
module attributes {stable_mosaic.version = 11 : i64} {
  func.func @_fused_attn_kernel(%arg0: memref<2x8x32xf32, #tpu.memory_space<vmem>>, %arg1: memref<3x8x32x4xf32, #tpu.memory_space<vmem>>, %arg2: memref<3x8x1x4xf32, #tpu.memory_space<vmem>>, %arg3: memref<8x4x32xf32, #tpu.memory_space<vmem>>, %arg4: memref<1x1x32xf32, #tpu.memory_space<vmem>>, %arg5: memref<2x8x32xf32, #tpu.memory_space<vmem>>) attributes {dimension_semantics = [], scalar_prefetch = 0 : i64, scratch_operands = 0 : i64, tpu.core_type = #tpu.core_type<tc>} {
    %c0 = arith.constant 0 : index
    %c0_0 = arith.constant 0 : index
    %c0_1 = arith.constant 0 : index
    %0 = vector.load %arg0[%c0, %c0_0, %c0_1] : memref<2x8x32xf32, #tpu.memory_space<vmem>>, vector<2x8x32xf32>
    %1 = vector.shape_cast %0 : vector<2x8x32xf32> to vector<2x1x8x32xf32>
    %2 = vector.shape_cast %1 : vector<2x1x8x32xf32> to vector<2x1x8x32xf32>
    %3 = vector.broadcast %2 : vector<2x1x8x32xf32> to vector<2x8x8x32xf32>
    %4 = vector.shape_cast %3 : vector<2x8x8x32xf32> to vector<16x8x32xf32>
    %c0_2 = arith.constant 0 : index
    %c0_3 = arith.constant 0 : index
    %c0_4 = arith.constant 0 : index
    %c0_5 = arith.constant 0 : index
    %5 = vector.load %arg1[%c0_2, %c0_3, %c0_4, %c0_5] : memref<3x8x32x4xf32, #tpu.memory_space<vmem>>, vector<1x8x32x4xf32>
    %6 = vector.shape_cast %5 : vector<1x8x32x4xf32> to vector<8x32x4xf32>
    %7 = vector.shape_cast %6 : vector<8x32x4xf32> to vector<1x8x32x4xf32>
    %8 = vector.shape_cast %7 : vector<1x8x32x4xf32> to vector<1x8x32x4xf32>
    %9 = vector.broadcast %8 : vector<1x8x32x4xf32> to vector<2x8x32x4xf32>
    %10 = vector.shape_cast %9 : vector<2x8x32x4xf32> to vector<16x32x4xf32>
    "tpu.trace_start"() <{level = 10 : i32, message = "gnc,gcd->gnd"}> : () -> ()
    %cst = arith.constant dense<0.000000e+00> : vector<16x8x4xf32>
    %11 = tpu.matmul %4, %10, %cst {dimension_numbers = #tpu.dot_dimension_numbers<[2], [1], [1], [2], [0, 0, 0, 1, 1, 2], [0], [0]>} : vector<16x8x32xf32>, vector<16x32x4xf32>, vector<16x8x4xf32> -> vector<16x8x4xf32>
    "tpu.trace_stop"() : () -> ()
    %c0_6 = arith.constant 0 : index
    %c0_7 = arith.constant 0 : index
    %c0_8 = arith.constant 0 : index
    %c0_9 = arith.constant 0 : index
    %12 = vector.load %arg2[%c0_6, %c0_7, %c0_8, %c0_9] : memref<3x8x1x4xf32, #tpu.memory_space<vmem>>, vector<1x8x1x4xf32>
    %13 = vector.shape_cast %12 : vector<1x8x1x4xf32> to vector<8x1x4xf32>
    %14 = vector.shape_cast %13 : vector<8x1x4xf32> to vector<1x8x1x4xf32>
    %15 = vector.shape_cast %14 : vector<1x8x1x4xf32> to vector<1x8x1x4xf32>
    %16 = vector.broadcast %15 : vector<1x8x1x4xf32> to vector<2x8x1x4xf32>
    %17 = vector.shape_cast %16 : vector<2x8x1x4xf32> to vector<16x1x4xf32>
    %18 = vector.broadcast %17 : vector<16x1x4xf32> to vector<16x8x4xf32>
    %19 = arith.addf %11, %18 : vector<16x8x4xf32>
    %c1 = arith.constant 1 : index
    %c0_10 = arith.constant 0 : index
    %c0_11 = arith.constant 0 : index
    %c0_12 = arith.constant 0 : index
    %20 = vector.load %arg1[%c1, %c0_10, %c0_11, %c0_12] : memref<3x8x32x4xf32, #tpu.memory_space<vmem>>, vector<1x8x32x4xf32>
    %21 = vector.shape_cast %20 : vector<1x8x32x4xf32> to vector<8x32x4xf32>
    %22 = vector.shape_cast %21 : vector<8x32x4xf32> to vector<1x8x32x4xf32>
    %23 = vector.shape_cast %22 : vector<1x8x32x4xf32> to vector<1x8x32x4xf32>
    %24 = vector.broadcast %23 : vector<1x8x32x4xf32> to vector<2x8x32x4xf32>
    %25 = vector.shape_cast %24 : vector<2x8x32x4xf32> to vector<16x32x4xf32>
    "tpu.trace_start"() <{level = 10 : i32, message = "gnc,gcd->gnd"}> : () -> ()
    %cst_13 = arith.constant dense<0.000000e+00> : vector<16x8x4xf32>
    %26 = tpu.matmul %4, %25, %cst_13 {dimension_numbers = #tpu.dot_dimension_numbers<[2], [1], [1], [2], [0, 0, 0, 1, 1, 2], [0], [0]>} : vector<16x8x32xf32>, vector<16x32x4xf32>, vector<16x8x4xf32> -> vector<16x8x4xf32>
    "tpu.trace_stop"() : () -> ()
    %c1_14 = arith.constant 1 : index
    %c0_15 = arith.constant 0 : index
    %c0_16 = arith.constant 0 : index
    %c0_17 = arith.constant 0 : index
    %27 = vector.load %arg2[%c1_14, %c0_15, %c0_16, %c0_17] : memref<3x8x1x4xf32, #tpu.memory_space<vmem>>, vector<1x8x1x4xf32>
    %28 = vector.shape_cast %27 : vector<1x8x1x4xf32> to vector<8x1x4xf32>
    %29 = vector.shape_cast %28 : vector<8x1x4xf32> to vector<1x8x1x4xf32>
    %30 = vector.shape_cast %29 : vector<1x8x1x4xf32> to vector<1x8x1x4xf32>
    %31 = vector.broadcast %30 : vector<1x8x1x4xf32> to vector<2x8x1x4xf32>
    %32 = vector.shape_cast %31 : vector<2x8x1x4xf32> to vector<16x1x4xf32>
    %33 = vector.broadcast %32 : vector<16x1x4xf32> to vector<16x8x4xf32>
    %34 = arith.addf %26, %33 : vector<16x8x4xf32>
    %c2 = arith.constant 2 : index
    %c0_18 = arith.constant 0 : index
    %c0_19 = arith.constant 0 : index
    %c0_20 = arith.constant 0 : index
    %35 = vector.load %arg1[%c2, %c0_18, %c0_19, %c0_20] : memref<3x8x32x4xf32, #tpu.memory_space<vmem>>, vector<1x8x32x4xf32>
    %36 = vector.shape_cast %35 : vector<1x8x32x4xf32> to vector<8x32x4xf32>
    %37 = vector.shape_cast %36 : vector<8x32x4xf32> to vector<1x8x32x4xf32>
    %38 = vector.shape_cast %37 : vector<1x8x32x4xf32> to vector<1x8x32x4xf32>
    %39 = vector.broadcast %38 : vector<1x8x32x4xf32> to vector<2x8x32x4xf32>
    %40 = vector.shape_cast %39 : vector<2x8x32x4xf32> to vector<16x32x4xf32>
    "tpu.trace_start"() <{level = 10 : i32, message = "gnc,gcd->gnd"}> : () -> ()
    %cst_21 = arith.constant dense<0.000000e+00> : vector<16x8x4xf32>
    %41 = tpu.matmul %4, %40, %cst_21 {dimension_numbers = #tpu.dot_dimension_numbers<[2], [1], [1], [2], [0, 0, 0, 1, 1, 2], [0], [0]>} : vector<16x8x32xf32>, vector<16x32x4xf32>, vector<16x8x4xf32> -> vector<16x8x4xf32>
    "tpu.trace_stop"() : () -> ()
    %c2_22 = arith.constant 2 : index
    %c0_23 = arith.constant 0 : index
    %c0_24 = arith.constant 0 : index
    %c0_25 = arith.constant 0 : index
    %42 = vector.load %arg2[%c2_22, %c0_23, %c0_24, %c0_25] : memref<3x8x1x4xf32, #tpu.memory_space<vmem>>, vector<1x8x1x4xf32>
    %43 = vector.shape_cast %42 : vector<1x8x1x4xf32> to vector<8x1x4xf32>
    %44 = vector.shape_cast %43 : vector<8x1x4xf32> to vector<1x8x1x4xf32>
    %45 = vector.shape_cast %44 : vector<1x8x1x4xf32> to vector<1x8x1x4xf32>
    %46 = vector.broadcast %45 : vector<1x8x1x4xf32> to vector<2x8x1x4xf32>
    %47 = vector.shape_cast %46 : vector<2x8x1x4xf32> to vector<16x1x4xf32>
    %48 = vector.broadcast %47 : vector<16x1x4xf32> to vector<16x8x4xf32>
    %49 = arith.addf %41, %48 : vector<16x8x4xf32>
    "tpu.trace_start"() <{level = 10 : i32, message = "gqd,gkd->gqk"}> : () -> ()
    %cst_26 = arith.constant dense<0.000000e+00> : vector<16x8x8xf32>
    %50 = tpu.matmul %19, %34, %cst_26 {dimension_numbers = #tpu.dot_dimension_numbers<[2], [2], [1], [1], [0, 0, 0, 1, 1, 1], [0], [0]>} : vector<16x8x4xf32>, vector<16x8x4xf32>, vector<16x8x8xf32> -> vector<16x8x8xf32>
    "tpu.trace_stop"() : () -> ()
    %cst_27 = arith.constant dense<0xFF800000> : vector<16x8xf32>
    %51 = vector.multi_reduction <maximumf>, %50, %cst_27 [2] : vector<16x8x8xf32> to vector<16x8xf32>
    %52 = vector.shape_cast %51 : vector<16x8xf32> to vector<16x8x1xf32>
    %53 = vector.broadcast %52 : vector<16x8x1xf32> to vector<16x8x8xf32>
    %54 = arith.subf %50, %53 : vector<16x8x8xf32>
    %55 = math.exp %54 : vector<16x8x8xf32>
    %cst_28 = arith.constant dense<0.000000e+00> : vector<16x8xf32>
    %56 = vector.multi_reduction <add>, %55, %cst_28 [2] : vector<16x8x8xf32> to vector<16x8xf32>
    %57 = vector.shape_cast %56 : vector<16x8xf32> to vector<16x8x1xf32>
    "tpu.trace_start"() <{level = 10 : i32, message = "gqk,gkd->gqd"}> : () -> ()
    %cst_29 = arith.constant dense<0.000000e+00> : vector<16x8x4xf32>
    %58 = tpu.matmul %55, %49, %cst_29 {dimension_numbers = #tpu.dot_dimension_numbers<[2], [1], [1], [2], [0, 0, 0, 1, 1, 2], [0], [0]>} : vector<16x8x8xf32>, vector<16x8x4xf32>, vector<16x8x4xf32> -> vector<16x8x4xf32>
    "tpu.trace_stop"() : () -> ()
    %59 = tpu.reciprocal %57 {approx = true} : vector<16x8x1xf32> -> vector<16x8x1xf32>
    %60 = vector.broadcast %59 : vector<16x8x1xf32> to vector<16x8x4xf32>
    %61 = arith.mulf %58, %60 : vector<16x8x4xf32>
    %c0_30 = arith.constant 0 : index
    %c0_31 = arith.constant 0 : index
    %c0_32 = arith.constant 0 : index
    %62 = vector.load %arg3[%c0_30, %c0_31, %c0_32] : memref<8x4x32xf32, #tpu.memory_space<vmem>>, vector<8x4x32xf32>
    %63 = vector.shape_cast %62 : vector<8x4x32xf32> to vector<1x8x4x32xf32>
    %64 = vector.shape_cast %63 : vector<1x8x4x32xf32> to vector<1x8x4x32xf32>
    %65 = vector.broadcast %64 : vector<1x8x4x32xf32> to vector<2x8x4x32xf32>
    %66 = vector.shape_cast %65 : vector<2x8x4x32xf32> to vector<16x4x32xf32>
    "tpu.trace_start"() <{level = 10 : i32, message = "gnd,gdc->gnc"}> : () -> ()
    %cst_33 = arith.constant dense<0.000000e+00> : vector<16x8x32xf32>
    %67 = tpu.matmul %61, %66, %cst_33 {dimension_numbers = #tpu.dot_dimension_numbers<[2], [1], [1], [2], [0, 0, 0, 1, 1, 2], [0], [0]>} : vector<16x8x4xf32>, vector<16x4x32xf32>, vector<16x8x32xf32> -> vector<16x8x32xf32>
    "tpu.trace_stop"() : () -> ()
    %68 = vector.shape_cast %67 : vector<16x8x32xf32> to vector<2x8x8x32xf32>
    %cst_34 = arith.constant dense<0.000000e+00> : vector<2x8x32xf32>
    %69 = vector.multi_reduction <add>, %68, %cst_34 [1] : vector<2x8x8x32xf32> to vector<2x8x32xf32>
    %c0_35 = arith.constant 0 : index
    %c0_36 = arith.constant 0 : index
    %c0_37 = arith.constant 0 : index
    %70 = vector.load %arg4[%c0_35, %c0_36, %c0_37] : memref<1x1x32xf32, #tpu.memory_space<vmem>>, vector<1x1x32xf32>
    %71 = vector.broadcast %70 : vector<1x1x32xf32> to vector<2x8x32xf32>
    %72 = arith.addf %69, %71 : vector<2x8x32xf32>
    %c0_38 = arith.constant 0 : index
    %c0_39 = arith.constant 0 : index
    %c0_40 = arith.constant 0 : index
    %73 = vector.load %arg5[%c0_38, %c0_39, %c0_40] : memref<2x8x32xf32, #tpu.memory_space<vmem>>, vector<2x8x32xf32>
    tpu.vector_store %arg5[%c0_38, %c0_39, %c0_40], %72 {strides = array<i32>} : memref<2x8x32xf32, #tpu.memory_space<vmem>>, vector<2x8x32xf32>,
    return
  }
}

</mosaic_0001>

<bundles_post_ra>
// kernel: tpu_custom_call.1
= control target key start
LH: loop header
LB: loop body
LE: loop exit
PB: predicated region body
PF: predicated region fallthrough
CT: control target
= control target key end

     0   :  { %v9197_v3 = vmov 0.0|0.0   ;;  %vm9198_vm0 = vmmov 0   ;;  %v9199_v11 = vmov 0.0   ;;  %vm111_vm1 = vcmask 261120   ;;  %s10614_s0 = inlined_call_operand.vmem [shape: f32[2,8,32], index: 0, kind: input, shape index: {}]   ;;  %s10615_s1 = inlined_call_operand.vmem [shape: f32[3,8,32,4], index: 1, kind: input, shape index: {}]   ;;  %s10616_s2 = inlined_call_operand.vmem [shape: f32[3,8,1,4], index: 2, kind: input, shape index: {}]   ;;  %s10617_s3 = inlined_call_operand.vmem [shape: f32[8,4,32], index: 3, kind: input, shape index: {}]   ;;  %s10618_s4 = inlined_call_operand.vmem [shape: f32[1,1,32], index: 4, kind: input, shape index: {}]   ;;  %s10619_s5 = inlined_call_operand.hbm [shape: f32[2,8,32], index: 5, kind: output, shape index: {}]  }
   0x1   :  { %v23_v0 = vld [vmem:[%s10615_s1] sm:$0xff]  ;;  %v24_v1 = vld [vmem:[%s10615_s1 + $0x8] sm:$0xff]  ;;  %8815 = vmatprep.subr.bf16.mxu0 %v9197_v3  ;;  %8821 = vmatprep.subr.bf16.mxu1 %v9197_v3  ;;  %v25_v6 = vld [vmem:[%s10615_s1 + $0x10] sm:$0xff] }
   0x2   :  { %v27_v2 = vld [vmem:[%s10615_s1 + $0x20] sm:$0xff]  ;;  %v9244_v4 = vpack.c.bf16 %v24_v1, %v23_v0  ;;  %v28_v5 = vld [vmem:[%s10615_s1 + $0x28] sm:$0xff]  ;;  %v26_v7 = vld [vmem:[%s10615_s1 + $0x18] sm:$0xff]  ;;  %8055 = vmatprep.mubr.msk.f32.mxu0 %vm9198_vm0, %v9199_v11  ;;  %8066 = vmatprep.mubr.msk.f32.mxu1 %vm9198_vm0, %v9199_v11 }
   0x3   :  { %v9255_v8 = vpack.c.bf16 %v28_v5, %v27_v2  ;;  %v29_v9 = vld [vmem:[%s10615_s1 + $0x30] sm:$0xff]  ;;  %v30_v10 = vld [vmem:[%s10615_s1 + $0x38] sm:$0xff]  ;;  %v9268_v12 = vpack.c.bf16 %v26_v7, %v25_v6  ;;  %v31_v14 = vld [vmem:[%s10615_s1 + $0x40] sm:$0xff] }
   0x4   :  { %8817 = vmatpush3.bf16.msra.mxu0 %v9244_v4  ;;  %v9272_v13 = vpack.c.bf16 %v30_v10, %v29_v9  ;;  %v32_v15 = vld [vmem:[%s10615_s1 + $0x48] sm:$0xff]  ;;  %v35_v16 = vld [vmem:[%s10615_s1 + $0x60] sm:$0xff]  ;;  %v33_v21 = vld [vmem:[%s10615_s1 + $0x50] sm:$0xff] }
   0x5   :  { %8823 = vmatpush3.bf16.msra.mxu1 %v9255_v8  ;;  %8818 = vmatprep.subr.bf16.mxu0 %v9197_v3  ;;  %v36_v17 = vld [vmem:[%s10615_s1 + $0x68] sm:$0xff]  ;;  %v9291_v18 = vld [vmem:[%s10614_s0] sm:$0xff]  ;;  %v9293_v19 = vpack.c.bf16 %v32_v15, %v31_v14  ;;  %v34_v22 = vld [vmem:[%s10615_s1 + $0x58] sm:$0xff] }
   0x6   :  { %8824 = vmatprep.subr.bf16.mxu1 %v9197_v3  ;;  %v9297_v20 = vpack.c.bf16 %v36_v17, %v35_v16  ;;  %v37_v23 = vld [vmem:[%s10615_s1 + $0x70] sm:$0xff]  ;;  %v38_v24 = vld [vmem:[%s10615_s1 + $0x78] sm:$0xff]  ;;  %v9317_v25 = vpack.c.bf16 %v34_v22, %v33_v21  ;;  %v39_v27 = vld [vmem:[%s10615_s1 + $0x80] sm:$0xff] }
   0x7   :  { %v9321_v26 = vpack.c.bf16 %v38_v24, %v37_v23  ;;  %v40_v28 = vld [vmem:[%s10615_s1 + $0x88] sm:$0xff]  ;;  %v43_v29 = vld [vmem:[%s10615_s1 + $0xa0] sm:$0xff]  ;;  %v41_v33 = vld [vmem:[%s10615_s1 + $0x90] sm:$0xff] }
   0x8   :  { %8820 = vmatpush3.bf16.msra.mxu0 %v9268_v12  ;;  %v44_v30 = vld [vmem:[%s10615_s1 + $0xa8] sm:$0xff]  ;;  %v9341_v31 = vpack.c.bf16 %v40_v28, %v39_v27  ;;  %v42_v34 = vld [vmem:[%s10615_s1 + $0x98] sm:$0xff]  ;;  %v45_v35 = vld [vmem:[%s10615_s1 + $0xb0] sm:$0xff] }
   0x9   :  { %8826 = vmatpush3.bf16.msra.mxu1 %v9272_v13  ;;  %8827 = vmatprep.subr.bf16.mxu0 %v9197_v3  ;;  %v9345_v32 = vpack.c.bf16 %v44_v30, %v43_v29  ;;  %v46_v36 = vld [vmem:[%s10615_s1 + $0xb8] sm:$0xff]  ;;  %v9365_v37 = vpack.c.bf16 %v42_v34, %v41_v33  ;;  %v47_v39 = vld [vmem:[%s10615_s1 + $0xc0] sm:$0xff]  ;;  %v48_v40 = vld [vmem:[%s10615_s1 + $0xc8] sm:$0xff] }
   0xa   :  { %8833 = vmatprep.subr.bf16.mxu1 %v9197_v3  ;;  %v9369_v38 = vpack.c.bf16 %v46_v36, %v45_v35  ;;  %v51_v41 = vld [vmem:[%s10615_s1 + $0xe0] sm:$0xff]  ;;  %v52_v42 = vld [vmem:[%s10615_s1 + $0xe8] sm:$0xff]  ;;  %v9389_v43 = vpack.c.bf16 %v48_v40, %v47_v39 }
   0xb   :  { %8056 = vmatmul.mubr.msk.f32.vlgmr.msra.gmra.mrb[0].mxu0 %vm111_vm1, %v9291_v18 }
   0xc   :  { %8067 = vmatmul.mubr.msk.f32.vlgmr.msra.gmra.mrb[0].mxu1 %vm111_vm1, %v9291_v18  ;;  %8829 = vmatpush3.bf16.msra.mxu0 %v9293_v19 }
   0xd   :  { %8835 = vmatpush3.bf16.msra.mxu1 %v9297_v20  ;;  %8830 = vmatprep.subr.bf16.mxu0 %v9197_v3 }
   0xe   :  { %8836 = vmatprep.subr.bf16.mxu1 %v9197_v3  ;;  %8077 = vmatprep.mubr.msk.f32.mxu0 %vm9198_vm0, %v9199_v11 }
   0xf   :  { %8088 = vmatprep.mubr.msk.f32.mxu1 %vm9198_vm0, %v9199_v11 }
  0x10   :  { %8832 = vmatpush3.bf16.msra.mxu0 %v9317_v25 }
  0x11   :  { %8838 = vmatpush3.bf16.msra.mxu1 %v9321_v26  ;;  %8839 = vmatprep.subr.bf16.mxu0 %v9197_v3 }
  0x12   :  { %8845 = vmatprep.subr.bf16.mxu1 %v9197_v3 }
  0x13   :  { %8078 = vmatmul.mubr.msk.f32.vlgmr.msra.gmra.mrb[2].mxu0 %vm111_vm1, %v9291_v18 }
  0x14   :  { %8089 = vmatmul.mubr.msk.f32.vlgmr.msra.gmra.mrb[2].mxu1 %vm111_vm1, %v9291_v18  ;;  %8841 = vmatpush3.bf16.msra.mxu0 %v9341_v31 }
  0x15   :  { %8847 = vmatpush3.bf16.msra.mxu1 %v9345_v32  ;;  %8842 = vmatprep.subr.bf16.mxu0 %v9197_v3 }
  0x16   :  { %8848 = vmatprep.subr.bf16.mxu1 %v9197_v3  ;;  %8099 = vmatprep.mubr.msk.f32.mxu0 %vm9198_vm0, %v9199_v11 }
  0x17   :  { %8110 = vmatprep.mubr.msk.f32.mxu1 %vm9198_vm0, %v9199_v11 }
  0x18   :  { %8844 = vmatpush3.bf16.msra.mxu0 %v9365_v37 }
  0x19   :  { %10 = vsyncpa [#allocation3], 0  ;;  %8850 = vmatpush3.bf16.msra.mxu1 %v9369_v38  ;;  %8851 = vmatprep.subr.bf16.mxu0 %v9197_v3  ;;  %v8858_v44 = vpack.c.bf16 %v52_v42, %v51_v41  ;;  %v49_v45 = vld [vmem:[%s10615_s1 + $0xd0] sm:$0xff]  ;;  %v50_v46 = vld [vmem:[%s10615_s1 + $0xd8] sm:$0xff]  ;;  %vm3658_vm2 = vcmask 31744   ;;  %vm4875_vm3 = vcmask 64512  }
  0x1a   :  { %8857 = vmatprep.subr.bf16.mxu1 %v9197_v3  ;;  %v53_v47 = vld [vmem:[%s10615_s1 + $0xf0] sm:$0xff]  ;;  %v54_v48 = vld [vmem:[%s10615_s1 + $0xf8] sm:$0xff]  ;;  %v8855_v49 = vpack.c.bf16 %v50_v46, %v49_v45  ;;  %v9435_v51 = vld [vmem:[%s10614_s0 + $0x8] sm:$0xff]  ;;  %vm6231_vm4 = vcmask 1043456  }
  0x1b   :  { %8100 = vmatmul.mubr.msk.f32.vlgmr.msra.gmra.mrb[4].mxu0 %vm111_vm1, %v9291_v18  ;;  %v8861_v50 = vpack.c.bf16 %v54_v48, %v53_v47  ;;  %v7502_v52 = vld [vmem:[%s10615_s1 + $0x100] sm:$0xff]  ;;  %v7503_v53 = vld [vmem:[%s10615_s1 + $0x108] sm:$0xff]  ;;  %v7504_v58 = vld [vmem:[%s10615_s1 + $0x110] sm:$0xff] }
  0x1c   :  { %8111 = vmatmul.mubr.msk.f32.vlgmr.msra.gmra.mrb[4].mxu1 %vm111_vm1, %v9291_v18  ;;  %8853 = vmatpush3.bf16.msra.mxu0 %v9389_v43  ;;  %v7506_v54 = vld [vmem:[%s10615_s1 + $0x120] sm:$0xff]  ;;  %v7507_v55 = vld [vmem:[%s10615_s1 + $0x128] sm:$0xff]  ;;  %v9495_v56 = vpack.c.bf16 %v7503_v53, %v7502_v52  ;;  %v7505_v59 = vld [vmem:[%s10615_s1 + $0x118] sm:$0xff] }
  0x1d   :  { %8859 = vmatpush3.bf16.msra.mxu1 %v8858_v44  ;;  %8854 = vmatprep.subr.bf16.mxu0 %v9197_v3  ;;  %v9498_v57 = vpack.c.bf16 %v7507_v55, %v7506_v54  ;;  %v7508_v60 = vld [vmem:[%s10615_s1 + $0x130] sm:$0xff]  ;;  %v7509_v61 = vld [vmem:[%s10615_s1 + $0x138] sm:$0xff]  ;;  %v9518_v62 = vpack.c.bf16 %v7505_v59, %v7504_v58  ;;  %v7510_v0 = vld [vmem:[%s10615_s1 + $0x140] sm:$0xff] }
  0x1e   :  { %8860 = vmatprep.subr.bf16.mxu1 %v9197_v3  ;;  %8121 = vmatprep.mubr.msk.f32.mxu0 %vm9198_vm0, %v9199_v11  ;;  %v9522_v63 = vpack.c.bf16 %v7509_v61, %v7508_v60  ;;  %v7511_v1 = vld [vmem:[%s10615_s1 + $0x148] sm:$0xff]  ;;  %v7514_v2 = vld [vmem:[%s10615_s1 + $0x160] sm:$0xff]  ;;  %v7512_v7 = vld [vmem:[%s10615_s1 + $0x150] sm:$0xff] }
  0x1f   :  { %8132 = vmatprep.mubr.msk.f32.mxu1 %vm9198_vm0, %v9199_v11  ;;  %v9542_v5 = vpack.c.bf16 %v7511_v1, %v7510_v0  ;;  %v7516_v9 = vld [vmem:[%s10615_s1 + $0x170] sm:$0xff]  ;;  %v7517_v10 = vld [vmem:[%s10615_s1 + $0x178] sm:$0xff]  ;;  %v7518_v14 = vld [vmem:[%s10615_s1 + $0x180] sm:$0xff] }
  0x20   :  { %8856 = vmatpush3.bf16.msra.mxu0 %v8855_v49  ;;  %v7519_v15 = vld [vmem:[%s10615_s1 + $0x188] sm:$0xff]  ;;  %v7522_v16 = vld [vmem:[%s10615_s1 + $0x1a0] sm:$0xff]  ;;  %v7520_v21 = vld [vmem:[%s10615_s1 + $0x190] sm:$0xff] }
  0x21   :  { %8862 = vmatpush3.bf16.msra.mxu1 %v8861_v50  ;;  %8863 = vmatprep.subr.bf16.mxu0 %v9197_v3  ;;  %v7523_v17 = vld [vmem:[%s10615_s1 + $0x1a8] sm:$0xff]  ;;  %v7521_v22 = vld [vmem:[%s10615_s1 + $0x198] sm:$0xff]  ;;  %v7524_v23 = vld [vmem:[%s10615_s1 + $0x1b0] sm:$0xff] }
  0x22   :  { %8869 = vmatprep.subr.bf16.mxu1 %v9197_v3  ;;  %v7525_v24 = vld [vmem:[%s10615_s1 + $0x1b8] sm:$0xff]  ;;  %v7526_v27 = vld [vmem:[%s10615_s1 + $0x1c0] sm:$0xff]  ;;  %v7527_v28 = vld [vmem:[%s10615_s1 + $0x1c8] sm:$0xff] }
  0x23   :  { %8122 = vmatmul.mubr.msk.f32.vlgmr.msra.gmra.mrb[6].mxu0 %vm111_vm1, %v9291_v18  ;;  %v7530_v29 = vld [vmem:[%s10615_s1 + $0x1e0] sm:$0xff]  ;;  %v7531_v30 = vld [vmem:[%s10615_s1 + $0x1e8] sm:$0xff]  ;;  %v7528_v33 = vld [vmem:[%s10615_s1 + $0x1d0] sm:$0xff] }
  0x24   :  { %8133 = vmatmul.mubr.msk.f32.vlgmr.msra.gmra.mrb[6].mxu1 %vm111_vm1, %v9291_v18  ;;  %8865 = vmatpush3.bf16.msra.mxu0 %v9244_v4  ;;  %v7515_v4 = vld [vmem:[%s10615_s1 + $0x168] sm:$0xff]  ;;  %v7529_v34 = vld [vmem:[%s10615_s1 + $0x1d8] sm:$0xff]  ;;  %v7532_v35 = vld [vmem:[%s10615_s1 + $0x1f0] sm:$0xff] }
  0x25   :  { %8871 = vmatpush3.bf16.msra.mxu1 %v9255_v8  ;;  %8866 = vmatprep.subr.bf16.mxu0 %v9197_v3  ;;  %v9546_v6 = vpack.c.bf16 %v7515_v4, %v7514_v2  ;;  %v7513_v8 = vld [vmem:[%s10615_s1 + $0x158] sm:$0xff]  ;;  %v7566_v39 = vld [vmem:[%s10615_s1 + $0x200] sm:$0xff]  ;;  %v7567_v40 = vld [vmem:[%s10615_s1 + $0x208] sm:$0xff] }
  0x26   :  { %8872 = vmatprep.subr.bf16.mxu1 %v9197_v3  ;;  %8143 = vmatprep.mubr.msk.f32.mxu0 %vm9198_vm0, %v9199_v11  ;;  %v7533_v36 = vld [vmem:[%s10615_s1 + $0x1f8] sm:$0xff]  ;;  %v7570_v41 = vld [vmem:[%s10615_s1 + $0x220] sm:$0xff]  ;;  %v7571_v42 = vld [vmem:[%s10615_s1 + $0x228] sm:$0xff] }
  0x27   :  { %8154 = vmatprep.mubr.msk.f32.mxu1 %vm9198_vm0, %v9199_v11  ;;  %v7568_v45 = vld [vmem:[%s10615_s1 + $0x210] sm:$0xff]  ;;  %v7569_v46 = vld [vmem:[%s10615_s1 + $0x218] sm:$0xff]  ;;  %v7574_v52 = vld [vmem:[%s10615_s1 + $0x240] sm:$0xff] }
  0x28   :  { %8868 = vmatpush3.bf16.msra.mxu0 %v9268_v12  ;;  %v9566_v12 = vpack.c.bf16 %v7513_v8, %v7512_v7  ;;  %v7572_v47 = vld [vmem:[%s10615_s1 + $0x230] sm:$0xff]  ;;  %v7573_v48 = vld [vmem:[%s10615_s1 + $0x238] sm:$0xff]  ;;  %v7575_v53 = vld [vmem:[%s10615_s1 + $0x248] sm:$0xff] }
  0x29   :  { %8874 = vmatpush3.bf16.msra.mxu1 %v9272_v13  ;;  %8875 = vmatprep.subr.bf16.mxu0 %v9197_v3  ;;  %v9570_v13 = vpack.c.bf16 %v7517_v10, %v7516_v9  ;;  %v7578_v54 = vld [vmem:[%s10615_s1 + $0x260] sm:$0xff]  ;;  %v7579_v55 = vld [vmem:[%s10615_s1 + $0x268] sm:$0xff]  ;;  %v7576_v58 = vld [vmem:[%s10615_s1 + $0x250] sm:$0xff] }
  0x2a   :  { %8881 = vmatprep.subr.bf16.mxu1 %v9197_v3  ;;  %v7577_v59 = vld [vmem:[%s10615_s1 + $0x258] sm:$0xff]  ;;  %v7580_v60 = vld [vmem:[%s10615_s1 + $0x270] sm:$0xff]  ;;  %v7582_v0 = vld [vmem:[%s10615_s1 + $0x280] sm:$0xff] }
  0x2b   :  { %8144 = vmatmul.mubr.msk.f32.vlgmr.msra.gmra.mrb[8].mxu0 %vm111_vm1, %v9435_v51  ;;  %v7581_v61 = vld [vmem:[%s10615_s1 + $0x278] sm:$0xff]  ;;  %v7583_v1 = vld [vmem:[%s10615_s1 + $0x288] sm:$0xff]  ;;  %v7586_v2 = vld [vmem:[%s10615_s1 + $0x2a0] sm:$0xff] }
  0x2c   :  { %8155 = vmatmul.mubr.msk.f32.vlgmr.msra.gmra.mrb[8].mxu1 %vm111_vm1, %v9435_v51  ;;  %8877 = vmatpush3.bf16.msra.mxu0 %v9293_v19  ;;  %v9590_v19 = vpack.c.bf16 %v7519_v15, %v7518_v14  ;;  %v7587_v4 = vld [vmem:[%s10615_s1 + $0x2a8] sm:$0xff]  ;;  %v7584_v7 = vld [vmem:[%s10615_s1 + $0x290] sm:$0xff]  ;;  %v7585_v8 = vld [vmem:[%s10615_s1 + $0x298] sm:$0xff] }
  0x2d   :  { %8883 = vmatpush3.bf16.msra.mxu1 %v9297_v20  ;;  %8878 = vmatprep.subr.bf16.mxu0 %v9197_v3  ;;  %v9594_v20 = vpack.c.bf16 %v7523_v17, %v7522_v16  ;;  %v7588_v9 = vld [vmem:[%s10615_s1 + $0x2b0] sm:$0xff]  ;;  %v7589_v10 = vld [vmem:[%s10615_s1 + $0x2b8] sm:$0xff]  ;;  %v7590_v14 = vld [vmem:[%s10615_s1 + $0x2c0] sm:$0xff] }
  0x2e   :  { %8884 = vmatprep.subr.bf16.mxu1 %v9197_v3  ;;  %8165 = vmatprep.mubr.msk.f32.mxu0 %vm9198_vm0, %v9199_v11  ;;  %v7591_v15 = vld [vmem:[%s10615_s1 + $0x2c8] sm:$0xff]  ;;  %v7594_v16 = vld [vmem:[%s10615_s1 + $0x2e0] sm:$0xff] }
  0x2f   :  { %8176 = vmatprep.mubr.msk.f32.mxu1 %vm9198_vm0, %v9199_v11  ;;  %v7595_v17 = vld [vmem:[%s10615_s1 + $0x2e8] sm:$0xff] }
  0x30   :  { %8880 = vmatpush3.bf16.msra.mxu0 %v9317_v25  ;;  %v9614_v25 = vpack.c.bf16 %v7521_v22, %v7520_v21  ;;  %v7592_v21 = vld [vmem:[%s10615_s1 + $0x2d0] sm:$0xff]  ;;  %v7593_v22 = vld [vmem:[%s10615_s1 + $0x2d8] sm:$0xff] }
  0x31   :  { %8886 = vmatpush3.bf16.msra.mxu1 %v9321_v26  ;;  %8887 = vmatprep.subr.bf16.mxu0 %v9197_v3  ;;  %v9618_v26 = vpack.c.bf16 %v7525_v24, %v7524_v23  ;;  %v7596_v23 = vld [vmem:[%s10615_s1 + $0x2f0] sm:$0xff]  ;;  %v7597_v24 = vld [vmem:[%s10615_s1 + $0x2f8] sm:$0xff] }
  0x32   :  { %8893 = vmatprep.subr.bf16.mxu1 %v9197_v3 }
  0x33   :  { %8166 = vmatmul.mubr.msk.f32.vlgmr.msra.gmra.mrb[10].mxu0 %vm111_vm1, %v9435_v51 }
  0x34   :  { %8177 = vmatmul.mubr.msk.f32.vlgmr.msra.gmra.mrb[10].mxu1 %vm111_vm1, %v9435_v51  ;;  %8889 = vmatpush3.bf16.msra.mxu0 %v9341_v31  ;;  %v8948_v31 = vpack.c.bf16 %v7527_v28, %v7526_v27 }
  0x35   :  { %8895 = vmatpush3.bf16.msra.mxu1 %v9345_v32  ;;  %8890 = vmatprep.subr.bf16.mxu0 %v9197_v3  ;;  %v8954_v32 = vpack.c.bf16 %v7531_v30, %v7530_v29 }
  0x36   :  { %8896 = vmatprep.subr.bf16.mxu1 %v9197_v3  ;;  %8187 = vmatprep.mubr.msk.f32.mxu0 %vm9198_vm0, %v9199_v11 }
  0x37   :  { %8198 = vmatprep.mubr.msk.f32.mxu1 %vm9198_vm0, %v9199_v11 }
  0x38   :  { %8892 = vmatpush3.bf16.msra.mxu0 %v9365_v37  ;;  %v8951_v37 = vpack.c.bf16 %v7529_v34, %v7528_v33 }
  0x39   :  { %8898 = vmatpush3.bf16.msra.mxu1 %v9369_v38  ;;  %8899 = vmatprep.subr.bf16.mxu0 %v9197_v3  ;;  %v8957_v38 = vpack.c.bf16 %v7533_v36, %v7532_v35 }
  0x3a   :  { %8905 = vmatprep.subr.bf16.mxu1 %v9197_v3 }
  0x3b   :  { %8188 = vmatmul.mubr.msk.f32.vlgmr.msra.gmra.mrb[12].mxu0 %vm111_vm1, %v9435_v51 }
  0x3c   :  { %8199 = vmatmul.mubr.msk.f32.vlgmr.msra.gmra.mrb[12].mxu1 %vm111_vm1, %v9435_v51  ;;  %8901 = vmatpush3.bf16.msra.mxu0 %v9389_v43  ;;  %v9735_v43 = vpack.c.bf16 %v7567_v40, %v7566_v39 }
  0x3d   :  { %8907 = vmatpush3.bf16.msra.mxu1 %v8858_v44  ;;  %8902 = vmatprep.subr.bf16.mxu0 %v9197_v3  ;;  %v9738_v44 = vpack.c.bf16 %v7571_v42, %v7570_v41 }
  0x3e   :  { %8908 = vmatprep.subr.bf16.mxu1 %v9197_v3  ;;  %8209 = vmatprep.mubr.msk.f32.mxu0 %vm9198_vm0, %v9199_v11 }
  0x3f   :  { %8220 = vmatprep.mubr.msk.f32.mxu1 %vm9198_vm0, %v9199_v11 }
  0x40   :  { %8904 = vmatpush3.bf16.msra.mxu0 %v8855_v49  ;;  %v9758_v49 = vpack.c.bf16 %v7569_v46, %v7568_v45 }
  0x41   :  { %8910 = vmatpush3.bf16.msra.mxu1 %v8861_v50  ;;  %8911 = vmatprep.subr.bf16.mxu0 %v9197_v3  ;;  %v9762_v50 = vpack.c.bf16 %v7573_v48, %v7572_v47 }
  0x42   :  { %8917 = vmatprep.subr.bf16.mxu1 %v9197_v3 }
  0x43   :  { %8210 = vmatmul.mubr.msk.f32.vlgmr.msra.gmra.mrb[14].mxu0 %vm111_vm1, %v9435_v51 }
  0x44   :  { %8221 = vmatmul.mubr.msk.f32.vlgmr.msra.gmra.mrb[14].mxu1 %vm111_vm1, %v9435_v51  ;;  %8913 = vmatpush3.bf16.msra.mxu0 %v9495_v56 }
  0x45   :  { %8919 = vmatpush3.bf16.msra.mxu1 %v9498_v57  ;;  %8914 = vmatprep.subr.bf16.mxu0 %v9197_v3 }
  0x46   :  { %8920 = vmatprep.subr.bf16.mxu1 %v9197_v3  ;;  %8231 = vmatprep.mubr.msk.f32.mxu0 %vm9198_vm0, %v9199_v11 }
  0x47   :  { %8242 = vmatprep.mubr.msk.f32.mxu1 %vm9198_vm0, %v9199_v11 }
  0x48   :  { %8916 = vmatpush3.bf16.msra.mxu0 %v9518_v62 }
  0x49   :  { %8922 = vmatpush3.bf16.msra.mxu1 %v9522_v63  ;;  %8923 = vmatprep.subr.bf16.mxu0 %v9197_v3 }
  0x4a   :  { %8929 = vmatprep.subr.bf16.mxu1 %v9197_v3 }
  0x4b   :  { %8232 = vmatmul.mubr.msk.f32.vlgmr.msra.gmra.mrb[16].mxu0 %vm111_vm1, %v9291_v18 }
  0x4c   :  { %8243 = vmatmul.mubr.msk.f32.vlgmr.msra.gmra.mrb[16].mxu1 %vm111_vm1, %v9291_v18  ;;  %8925 = vmatpush3.bf16.msra.mxu0 %v9542_v5 }
  0x4d   :  { %8931 = vmatpush3.bf16.msra.mxu1 %v9546_v6  ;;  %8926 = vmatprep.subr.bf16.mxu0 %v9197_v3 }
  0x4e   :  { %8932 = vmatprep.subr.bf16.mxu1 %v9197_v3  ;;  %8253 = vmatprep.mubr.msk.f32.mxu0 %vm9198_vm0, %v9199_v11 }
  0x4f   :  { %8264 = vmatprep.mubr.msk.f32.mxu1 %vm9198_vm0, %v9199_v11 }
  0x50   :  { %8928 = vmatpush3.bf16.msra.mxu0 %v9566_v12 }
  0x51   :  { %8934 = vmatpush3.bf16.msra.mxu1 %v9570_v13  ;;  %8935 = vmatprep.subr.bf16.mxu0 %v9197_v3 }
  0x52   :  { %8941 = vmatprep.subr.bf16.mxu1 %v9197_v3 }
  0x53   :  { %8254 = vmatmul.mubr.msk.f32.vlgmr.msra.gmra.mrb[18].mxu0 %vm111_vm1, %v9291_v18 }
  0x54   :  { %8265 = vmatmul.mubr.msk.f32.vlgmr.msra.gmra.mrb[18].mxu1 %vm111_vm1, %v9291_v18  ;;  %8937 = vmatpush3.bf16.msra.mxu0 %v9590_v19 }
  0x55   :  { %8943 = vmatpush3.bf16.msra.mxu1 %v9594_v20  ;;  %8938 = vmatprep.subr.bf16.mxu0 %v9197_v3 }
  0x56   :  { %8944 = vmatprep.subr.bf16.mxu1 %v9197_v3  ;;  %8275 = vmatprep.mubr.msk.f32.mxu0 %vm9198_vm0, %v9199_v11 }
  0x57   :  { %8286 = vmatprep.mubr.msk.f32.mxu1 %vm9198_vm0, %v9199_v11 }
  0x58   :  { %8940 = vmatpush3.bf16.msra.mxu0 %v9614_v25 }
  0x59   :  { %8946 = vmatpush3.bf16.msra.mxu1 %v9618_v26  ;;  %8947 = vmatprep.subr.bf16.mxu0 %v9197_v3 }
  0x5a   :  { %8953 = vmatprep.subr.bf16.mxu1 %v9197_v3 }
  0x5b   :  { %8276 = vmatmul.mubr.msk.f32.vlgmr.msra.gmra.mrb[20].mxu0 %vm111_vm1, %v9291_v18 }
  0x5c   :  { %8287 = vmatmul.mubr.msk.f32.vlgmr.msra.gmra.mrb[20].mxu1 %vm111_vm1, %v9291_v18  ;;  %8949 = vmatpush3.bf16.msra.mxu0 %v8948_v31 }
  0x5d   :  { %8955 = vmatpush3.bf16.msra.mxu1 %v8954_v32  ;;  %8950 = vmatprep.subr.bf16.mxu0 %v9197_v3 }
  0x5e   :  { %8956 = vmatprep.subr.bf16.mxu1 %v9197_v3  ;;  %8297 = vmatprep.mubr.msk.f32.mxu0 %vm9198_vm0, %v9199_v11 }
  0x5f   :  { %8308 = vmatprep.mubr.msk.f32.mxu1 %vm9198_vm0, %v9199_v11 }
  0x60   :  { %8952 = vmatpush3.bf16.msra.mxu0 %v8951_v37 }
  0x61   :  { %8958 = vmatpush3.bf16.msra.mxu1 %v8957_v38  ;;  %8959 = vmatprep.subr.bf16.mxu0 %v9197_v3 }
  0x62   :  { %8965 = vmatprep.subr.bf16.mxu1 %v9197_v3 }
  0x63   :  { %8298 = vmatmul.mubr.msk.f32.vlgmr.msra.gmra.mrb[22].mxu0 %vm111_vm1, %v9291_v18 }
  0x64   :  { %8309 = vmatmul.mubr.msk.f32.vlgmr.msra.gmra.mrb[22].mxu1 %vm111_vm1, %v9291_v18  ;;  %8961 = vmatpush3.bf16.msra.mxu0 %v9495_v56  ;;  %v9782_v56 = vpack.c.bf16 %v7575_v53, %v7574_v52 }
  0x65   :  { %8967 = vmatpush3.bf16.msra.mxu1 %v9498_v57  ;;  %8962 = vmatprep.subr.bf16.mxu0 %v9197_v3  ;;  %v9786_v57 = vpack.c.bf16 %v7579_v55, %v7578_v54 }
  0x66   :  { %8968 = vmatprep.subr.bf16.mxu1 %v9197_v3  ;;  %8319 = vmatprep.mubr.msk.f32.mxu0 %vm9198_vm0, %v9199_v11 }
  0x67   :  { %8330 = vmatprep.mubr.msk.f32.mxu1 %vm9198_vm0, %v9199_v11 }
  0x68   :  { %8964 = vmatpush3.bf16.msra.mxu0 %v9518_v62  ;;  %v9806_v62 = vpack.c.bf16 %v7577_v59, %v7576_v58  ;;  %v10005_v58 = vld [vmem:[%s10616_s2 + $0x9] ss:$0 sm:$0xff] }
  0x69   :  { %8970 = vmatpush3.bf16.msra.mxu1 %v9522_v63  ;;  %8971 = vmatprep.subr.bf16.mxu0 %v9197_v3  ;;  %v9810_v63 = vpack.c.bf16 %v7581_v61, %v7580_v60  ;;  %v10010_v60 = vld [vmem:[%s10616_s2] ss:$0 sm:$0xff] }
  0x6a   :  { %8977 = vmatprep.subr.bf16.mxu1 %v9197_v3 }
  0x6b   :  { %8320 = vmatmul.mubr.msk.f32.vlgmr.msra.gmra.mrb[24].mxu0 %vm111_vm1, %v9435_v51 }
  0x6c   :  { %8331 = vmatmul.mubr.msk.f32.vlgmr.msra.gmra.mrb[24].mxu1 %vm111_vm1, %v9435_v51  ;;  %8973 = vmatpush3.bf16.msra.mxu0 %v9542_v5  ;;  %v9830_v5 = vpack.c.bf16 %v7583_v1, %v7582_v0  ;;  %v10016_v0 = vld [vmem:[%s10616_s2 + $0x1] ss:$0 sm:$0xff] }
  0x6d   :  { %8979 = vmatpush3.bf16.msra.mxu1 %v9546_v6  ;;  %8974 = vmatprep.subr.bf16.mxu0 %v9197_v3  ;;  %v9834_v6 = vpack.c.bf16 %v7587_v4, %v7586_v2 }
  0x6e   :  { %8980 = vmatprep.subr.bf16.mxu1 %v9197_v3  ;;  %8341 = vmatprep.mubr.msk.f32.mxu0 %vm9198_vm0, %v9199_v11 }
  0x6f   :  { %8352 = vmatprep.mubr.msk.f32.mxu1 %vm9198_vm0, %v9199_v11 }
  0x70   :  { %8976 = vmatpush3.bf16.msra.mxu0 %v9566_v12  ;;  %v9854_v12 = vpack.c.bf16 %v7585_v8, %v7584_v7  ;;  %v10035_v7 = vld [vmem:[%s10616_s2 + $0xb] ss:$0 sm:$0xff] }
  0x71   :  { %8982 = vmatpush3.bf16.msra.mxu1 %v9570_v13  ;;  %8983 = vmatprep.subr.bf16.mxu0 %v9197_v3  ;;  %v9858_v13 = vpack.c.bf16 %v7589_v10, %v7588_v9  ;;  %v10044_v9 = vld [vmem:[%s10616_s2 + $0x2] ss:$0 sm:$0xff] }
  0x72   :  { %8989 = vmatprep.subr.bf16.mxu1 %v9197_v3 }
  0x73   :  { %8342 = vmatmul.mubr.msk.f32.vlgmr.msra.gmra.mrb[26].mxu0 %vm111_vm1, %v9435_v51 }
  0x74   :  { %8353 = vmatmul.mubr.msk.f32.vlgmr.msra.gmra.mrb[26].mxu1 %vm111_vm1, %v9435_v51  ;;  %8985 = vmatpush3.bf16.msra.mxu0 %v9590_v19  ;;  %v9044_v19 = vpack.c.bf16 %v7591_v15, %v7590_v14  ;;  %v10050_v14 = vld [vmem:[%s10616_s2 + $0x3] ss:$0 sm:$0xff] }
  0x75   :  { %8991 = vmatpush3.bf16.msra.mxu1 %v9594_v20  ;;  %8986 = vmatprep.subr.bf16.mxu0 %v9197_v3  ;;  %v9050_v20 = vpack.c.bf16 %v7595_v17, %v7594_v16 }
  0x76   :  { %8992 = vmatprep.subr.bf16.mxu1 %v9197_v3  ;;  %8363 = vmatprep.mubr.msk.f32.mxu0 %vm9198_vm0, %v9199_v11 }
  0x77   :  { %8374 = vmatprep.mubr.msk.f32.mxu1 %vm9198_vm0, %v9199_v11 }
  0x78   :  { %8988 = vmatpush3.bf16.msra.mxu0 %v9614_v25  ;;  %v9047_v25 = vpack.c.bf16 %v7593_v22, %v7592_v21  ;;  %v10069_v21 = vld [vmem:[%s10616_s2 + $0xd] ss:$0 sm:$0xff] }
  0x79   :  { %8994 = vmatpush3.bf16.msra.mxu1 %v9618_v26  ;;  %8995 = vmatprep.subr.bf16.mxu0 %v9197_v3  ;;  %v9053_v26 = vpack.c.bf16 %v7597_v24, %v7596_v23  ;;  %v10078_v23 = vld [vmem:[%s10616_s2 + $0x4] ss:$0 sm:$0xff] }
  0x7a   :  { %9001 = vmatprep.subr.bf16.mxu1 %v9197_v3 }
  0x7b   :  { %8364 = vmatmul.mubr.msk.f32.vlgmr.msra.gmra.mrb[28].mxu0 %vm111_vm1, %v9435_v51 }
  0x7c   :  { %8375 = vmatmul.mubr.msk.f32.vlgmr.msra.gmra.mrb[28].mxu1 %vm111_vm1, %v9435_v51  ;;  %8997 = vmatpush3.bf16.msra.mxu0 %v8948_v31 }
  0x7d   :  { %9003 = vmatpush3.bf16.msra.mxu1 %v8954_v32  ;;  %8998 = vmatprep.subr.bf16.mxu0 %v9197_v3 }
  0x7e   :  { %9004 = vmatprep.subr.bf16.mxu1 %v9197_v3  ;;  %8385 = vmatprep.mubr.msk.f32.mxu0 %vm9198_vm0, %v9199_v11 }
  0x7f   :  { %8396 = vmatprep.mubr.msk.f32.mxu1 %vm9198_vm0, %v9199_v11 }
  0x80   :  { %9000 = vmatpush3.bf16.msra.mxu0 %v8951_v37 }
  0x81   :  { %9006 = vmatpush3.bf16.msra.mxu1 %v8957_v38  ;;  %9007 = vmatprep.subr.bf16.mxu0 %v9197_v3 }
  0x82   :  { %9013 = vmatprep.subr.bf16.mxu1 %v9197_v3 }
  0x83   :  { %8386 = vmatmul.mubr.msk.f32.vlgmr.msra.gmra.mrb[30].mxu0 %vm111_vm1, %v9435_v51 }
  0x84   :  { %8397 = vmatmul.mubr.msk.f32.vlgmr.msra.gmra.mrb[30].mxu1 %vm111_vm1, %v9435_v51  ;;  %9009 = vmatpush3.bf16.msra.mxu0 %v9735_v43 }
  0x85   :  { %9015 = vmatpush3.bf16.msra.mxu1 %v9738_v44  ;;  %9010 = vmatprep.subr.bf16.mxu0 %v9197_v3 }
  0x86   :  { %9016 = vmatprep.subr.bf16.mxu1 %v9197_v3  ;;  %8407 = vmatprep.mubr.msk.f32.mxu0 %vm9198_vm0, %v9199_v11 }
  0x87   :  { %8418 = vmatprep.mubr.msk.f32.mxu1 %vm9198_vm0, %v9199_v11 }
  0x88   :  { %9012 = vmatpush3.bf16.msra.mxu0 %v9758_v49 }
  0x89   :  { %9018 = vmatpush3.bf16.msra.mxu1 %v9762_v50  ;;  %9019 = vmatprep.subr.bf16.mxu0 %v9197_v3 }
  0x8a   :  { %9025 = vmatprep.subr.bf16.mxu1 %v9197_v3 }
  0x8b   :  { %8408 = vmatmul.mubr.msk.f32.vlgmr.msra.gmra.mrb[32].mxu0 %vm111_vm1, %v9291_v18 }
  0x8c   :  { %8419 = vmatmul.mubr.msk.f32.vlgmr.msra.gmra.mrb[32].mxu1 %vm111_vm1, %v9291_v18  ;;  %9021 = vmatpush3.bf16.msra.mxu0 %v9782_v56 }
  0x8d   :  { %9027 = vmatpush3.bf16.msra.mxu1 %v9786_v57  ;;  %9022 = vmatprep.subr.bf16.mxu0 %v9197_v3 }
  0x8e   :  { %9028 = vmatprep.subr.bf16.mxu1 %v9197_v3  ;;  %8429 = vmatprep.mubr.msk.f32.mxu0 %vm9198_vm0, %v9199_v11 }
  0x8f   :  { %8440 = vmatprep.mubr.msk.f32.mxu1 %vm9198_vm0, %v9199_v11 }
  0x90   :  { %9024 = vmatpush3.bf16.msra.mxu0 %v9806_v62 }
  0x91   :  { %9030 = vmatpush3.bf16.msra.mxu1 %v9810_v63  ;;  %9031 = vmatprep.subr.bf16.mxu0 %v9197_v3 }
  0x92   :  { %9037 = vmatprep.subr.bf16.mxu1 %v9197_v3 }
  0x93   :  { %8430 = vmatmul.mubr.msk.f32.vlgmr.msra.gmra.mrb[34].mxu0 %vm111_vm1, %v9291_v18 }
  0x94   :  { %8441 = vmatmul.mubr.msk.f32.vlgmr.msra.gmra.mrb[34].mxu1 %vm111_vm1, %v9291_v18  ;;  %9033 = vmatpush3.bf16.msra.mxu0 %v9830_v5 }
  0x95   :  { %9039 = vmatpush3.bf16.msra.mxu1 %v9834_v6  ;;  %9034 = vmatprep.subr.bf16.mxu0 %v9197_v3 }
  0x96   :  { %9040 = vmatprep.subr.bf16.mxu1 %v9197_v3  ;;  %8451 = vmatprep.mubr.msk.f32.mxu0 %vm9198_vm0, %v9199_v11 }
  0x97   :  { %8462 = vmatprep.mubr.msk.f32.mxu1 %vm9198_vm0, %v9199_v11 }
  0x98   :  { %9036 = vmatpush3.bf16.msra.mxu0 %v9854_v12 }
  0x99   :  { %9042 = vmatpush3.bf16.msra.mxu1 %v9858_v13  ;;  %9043 = vmatprep.subr.bf16.mxu0 %v9197_v3 }
  0x9a   :  { %9049 = vmatprep.subr.bf16.mxu1 %v9197_v3 }
  0x9b   :  { %8452 = vmatmul.mubr.msk.f32.vlgmr.msra.gmra.mrb[36].mxu0 %vm111_vm1, %v9291_v18 }
  0x9c   :  { %8463 = vmatmul.mubr.msk.f32.vlgmr.msra.gmra.mrb[36].mxu1 %vm111_vm1, %v9291_v18  ;;  %9045 = vmatpush3.bf16.msra.mxu0 %v9044_v19 }
  0x9d   :  { %9051 = vmatpush3.bf16.msra.mxu1 %v9050_v20  ;;  %9046 = vmatprep.subr.bf16.mxu0 %v9197_v3 }
  0x9e   :  { %9052 = vmatprep.subr.bf16.mxu1 %v9197_v3  ;;  %8473 = vmatprep.mubr.msk.f32.mxu0 %vm9198_vm0, %v9199_v11 }
  0x9f   :  { %8484 = vmatprep.mubr.msk.f32.mxu1 %vm9198_vm0, %v9199_v11 }
  0xa0   :  { %9048 = vmatpush3.bf16.msra.mxu0 %v9047_v25 }
  0xa1   :  { %9054 = vmatpush3.bf16.msra.mxu1 %v9053_v26  ;;  %9055 = vmatprep.subr.bf16.mxu0 %v9197_v3 }
  0xa2   :  { %9061 = vmatprep.subr.bf16.mxu1 %v9197_v3 }
  0xa3   :  { %8474 = vmatmul.mubr.msk.f32.vlgmr.msra.gmra.mrb[38].mxu0 %vm111_vm1, %v9291_v18 }
  0xa4   :  { %8485 = vmatmul.mubr.msk.f32.vlgmr.msra.gmra.mrb[38].mxu1 %vm111_vm1, %v9291_v18  ;;  %9057 = vmatpush3.bf16.msra.mxu0 %v9735_v43 }
  0xa5   :  { %9063 = vmatpush3.bf16.msra.mxu1 %v9738_v44  ;;  %9058 = vmatprep.subr.bf16.mxu0 %v9197_v3 }
  0xa6   :  { %9064 = vmatprep.subr.bf16.mxu1 %v9197_v3  ;;  %8495 = vmatprep.mubr.msk.f32.mxu0 %vm9198_vm0, %v9199_v11 }
  0xa7   :  { %8506 = vmatprep.mubr.msk.f32.mxu1 %vm9198_vm0, %v9199_v11 }
  0xa8   :  { %9060 = vmatpush3.bf16.msra.mxu0 %v9758_v49 }
  0xa9   :  { %9066 = vmatpush3.bf16.msra.mxu1 %v9762_v50  ;;  %9067 = vmatprep.subr.bf16.mxu0 %v9197_v3 }
  0xaa   :  { %9073 = vmatprep.subr.bf16.mxu1 %v9197_v3 }
  0xab   :  { %8496 = vmatmul.mubr.msk.f32.vlgmr.msra.gmra.mrb[40].mxu0 %vm111_vm1, %v9435_v51 }
  0xac   :  { %8507 = vmatmul.mubr.msk.f32.vlgmr.msra.gmra.mrb[40].mxu1 %vm111_vm1, %v9435_v51  ;;  %9069 = vmatpush3.bf16.msra.mxu0 %v9782_v56 }
  0xad   :  { %9075 = vmatpush3.bf16.msra.mxu1 %v9786_v57  ;;  %9070 = vmatprep.subr.bf16.mxu0 %v9197_v3  ;;  %v10000_v57 = vld [vmem:[%s10616_s2 + $0x8] ss:$0 sm:$0xff] }
  0xae   :  { %9076 = vmatprep.subr.bf16.mxu1 %v9197_v3  ;;  %8517 = vmatprep.mubr.msk.f32.mxu0 %vm9198_vm0, %v9199_v11 }
  0xaf   :  { %8528 = vmatprep.mubr.msk.f32.mxu1 %vm9198_vm0, %v9199_v11 }
  0xb0   :  { %9072 = vmatpush3.bf16.msra.mxu0 %v9806_v62 }
  0xb1   :  { %9078 = vmatpush3.bf16.msra.mxu1 %v9810_v63  ;;  %9079 = vmatprep.subr.bf16.mxu0 %v9197_v3 }
  0xb2   :  { %9085 = vmatprep.subr.bf16.mxu1 %v9197_v3 }
  0xb3   :  { %8518 = vmatmul.mubr.msk.f32.vlgmr.msra.gmra.mrb[42].mxu0 %vm111_vm1, %v9435_v51 }
  0xb4   :  { %8529 = vmatmul.mubr.msk.f32.vlgmr.msra.gmra.mrb[42].mxu1 %vm111_vm1, %v9435_v51  ;;  %9081 = vmatpush3.bf16.msra.mxu0 %v9830_v5 }
  0xb5   :  { %9087 = vmatpush3.bf16.msra.mxu1 %v9834_v6  ;;  %9082 = vmatprep.subr.bf16.mxu0 %v9197_v3  ;;  %v10029_v6 = vld [vmem:[%s10616_s2 + $0xa] ss:$0 sm:$0xff] }
  0xb6   :  { %9088 = vmatprep.subr.bf16.mxu1 %v9197_v3  ;;  %8539 = vmatprep.mubr.msk.f32.mxu0 %vm9198_vm0, %v9199_v11 }
  0xb7   :  { %8550 = vmatprep.mubr.msk.f32.mxu1 %vm9198_vm0, %v9199_v11 }
  0xb8   :  { %9084 = vmatpush3.bf16.msra.mxu0 %v9854_v12 }
  0xb9   :  { %9090 = vmatpush3.bf16.msra.mxu1 %v9858_v13  ;;  %9091 = vmatprep.subr.bf16.mxu0 %v9197_v3 }
  0xba   :  { %9097 = vmatprep.subr.bf16.mxu1 %v9197_v3 }
  0xbb   :  { %8540 = vmatmul.mubr.msk.f32.vlgmr.msra.gmra.mrb[44].mxu0 %vm111_vm1, %v9435_v51 }
  0xbc   :  { %8551 = vmatmul.mubr.msk.f32.vlgmr.msra.gmra.mrb[44].mxu1 %vm111_vm1, %v9435_v51  ;;  %9093 = vmatpush3.bf16.msra.mxu0 %v9044_v19 }
  0xbd   :  { %9099 = vmatpush3.bf16.msra.mxu1 %v9050_v20  ;;  %9094 = vmatprep.subr.bf16.mxu0 %v9197_v3  ;;  %v10063_v20 = vld [vmem:[%s10616_s2 + $0xc] ss:$0 sm:$0xff] }
  0xbe   :  { %9100 = vmatprep.subr.bf16.mxu1 %v9197_v3  ;;  %8561 = vmatprep.mubr.msk.f32.mxu0 %vm9198_vm0, %v9199_v11 }
  0xbf   :  { %8572 = vmatprep.mubr.msk.f32.mxu1 %vm9198_vm0, %v9199_v11 }
  0xc0   :  { %9096 = vmatpush3.bf16.msra.mxu0 %v9047_v25 }
  0xc1   :  { %9102 = vmatpush3.bf16.msra.mxu1 %v9053_v26  ;;  %8575 = vmatprep.subr.mxu0 %v9199_v11 }
  0xc2   :  { %8580 = vmatprep.subr.mxu1 %v9199_v11 }
  0xc3   :  { %8562 = vmatmul.mubr.msk.f32.vlgmr.msra.gmra.mrb[46].mxu0 %vm111_vm1, %v9435_v51 }
  0xc4   :  { %8573 = vmatmul.mubr.msk.f32.vlgmr.msra.gmra.mrb[46].mxu1 %vm111_vm1, %v9435_v51  ;;  %8577 = vmatprep.mubr.msk.f32.mxu0 %vm9198_vm0, %v9199_v11 }
  0xc5   :  { %8582 = vmatprep.mubr.msk.f32.mxu1 %vm9198_vm0, %v9199_v11 }
  0xde   :  { %v181_v3 = vpop.f32.mrb[0].mxu0 }
  0xdf   :  { %v8057_v18 = vpop.f32.mrb[1].mxu0  ;;  %v251_v27 = vpop.f32.mrb[0].mxu1  ;;  %v182_v4 = vadd.f32 %v10010_v60, %v181_v3  ;;  %v10084_v3 = vld [vmem:[%s10616_s2 + $0x5] ss:$0 sm:$0xff] }
  0xe0   :  { %v8068_v28 = vpop.f32.mrb[1].mxu1  ;;  %v252_v5 = vadd.f32 %v10016_v0, %v251_v27 }
  0xe6   :  { %v321_v29 = vpop.f32.mrb[2].mxu0 }
  0xe7   :  { %v8079_v30 = vpop.f32.mrb[3].mxu0  ;;  %v391_v31 = vpop.f32.mrb[2].mxu1  ;;  %v322_v17 = vadd.f32 %v10044_v9, %v321_v29 }
  0xe8   :  { %v8090_v32 = vpop.f32.mrb[3].mxu1  ;;  %v392_v19 = vadd.f32 %v10050_v14, %v391_v31  ;;  %v10099_v30 = vld [vmem:[%s10616_s2 + $0xe] ss:$0 sm:$0xff]  ;;  %v10105_v31 = vld [vmem:[%s10616_s2 + $0xf] ss:$0 sm:$0xff] }
  0xee   :  { %v9973_v33 = vpop.f32.mrb[4].mxu0 }
  0xef   :  { %v8101_v34 = vpop.f32.mrb[5].mxu0  ;;  %v9975_v35 = vpop.f32.mrb[4].mxu1  ;;  %v462_v28 = vadd.f32 %v10078_v23, %v9973_v33  ;;  %v10114_v33 = vld [vmem:[%s10616_s2 + $0x6] ss:$0 sm:$0xff] }
  0xf0   :  { %v8112_v51 = vpop.f32.mrb[5].mxu1  ;;  %v532_v29 = vadd.f32 %v10084_v3, %v9975_v35 }
  0xf6   :  { %v9977_v36 = vpop.f32.mrb[6].mxu0 }
  0xf7   :  { %v8123_v37 = vpop.f32.mrb[7].mxu0  ;;  %v9979_v38 = vpop.f32.mrb[6].mxu1 }
  0xf8   :  { %v8134_v39 = vpop.f32.mrb[7].mxu1  ;;  %v10120_v37 = vld [vmem:[%s10616_s2 + $0x7] ss:$0 sm:$0xff] }
  0xfe   :  { %v9981_v40 = vpop.f32.mrb[8].mxu0 }
  0xff   :  { %v8145_v41 = vpop.f32.mrb[9].mxu0  ;;  %v9983_v42 = vpop.f32.mrb[8].mxu1 }
 0x100   :  { %v8156_v43 = vpop.f32.mrb[9].mxu1 }
 0x101   :  { %v602_v43 = vadd.f32 %v10114_v33, %v9977_v36 }
 0x106   :  { %v9985_v44 = vpop.f32.mrb[10].mxu0 }
 0x107   :  { %v8167_v45 = vpop.f32.mrb[11].mxu0  ;;  %v9987_v46 = vpop.f32.mrb[10].mxu1 }
 0x108   :  { %v8178_v47 = vpop.f32.mrb[11].mxu1  ;;  %v672_v45 = vadd.f32 %v10120_v37, %v9979_v38 }
 0x10e   :  { %v9989_v48 = vpop.f32.mrb[12].mxu0 }
 0x10f   :  { %v8189_v49 = vpop.f32.mrb[13].mxu0  ;;  %v9991_v50 = vpop.f32.mrb[12].mxu1 }
 0x110   :  { %v8200_v52 = vpop.f32.mrb[13].mxu1 }
 0x116   :  { %v9993_v53 = vpop.f32.mrb[14].mxu0 }
 0x117   :  { %v8211_v54 = vpop.f32.mrb[15].mxu0  ;;  %v9995_v55 = vpop.f32.mrb[14].mxu1 }
 0x118   :  { %v8222_v56 = vpop.f32.mrb[15].mxu1 }
 0x119   :  { %v745_v56 = vadd.f32 %v10010_v60, %v9981_v40 }
 0x11e   :  { %v1394_v59 = vpop.f32.mrb[16].mxu0 }
 0x11f   :  { %v1395_v61 = vadd.f32 %v10000_v57, %v1394_v59  ;;  %v1464_v62 = vpop.f32.mrb[16].mxu1  ;;  %v8233_v63 = vpop.f32.mrb[17].mxu0  ;;  %v815_v59 = vadd.f32 %v10016_v0, %v9983_v42 }
 0x120   :  { %v1465_v1 = vadd.f32 %v10005_v58, %v1464_v62  ;;  %v8244_v2 = vpop.f32.mrb[17].mxu1  ;;  %v885_v62 = vadd.f32 %v10044_v9, %v9985_v44  ;;  %v955_v63 = vadd.f32 %v10050_v14, %v9987_v46  ;;  %v7606_v14 = vld [vmem:[%s10616_s2 + $0x10] ss:$0 sm:$0xff] }
 0x121   :  { %8576 = vmatpush3.xpose.msk.msra.mxu0 %vm3658_vm2, %v1395_v61 }
 0x122   :  { %8581 = vmatpush3.xpose.msk.msra.mxu1 %vm3658_vm2, %v1465_v1  ;;  %8585 = vmatprep.subr.mxu0 %v9199_v11 }
 0x123   :  { %8590 = vmatprep.subr.mxu1 %v9199_v11 }
 0x124   :  { %8578 = vmatmul.mubr.msk.f32.vlgmr.msra.gmra.mrb[48].mxu0 %vm3658_vm2, %v182_v4 }
 0x125   :  { %8583 = vmatmul.mubr.msk.f32.vlgmr.msra.gmra.mrb[48].mxu1 %vm3658_vm2, %v252_v5  ;;  %8587 = vmatprep.mubr.msk.f32.mxu0 %vm9198_vm0, %v9199_v11  ;;  %v1025_v5 = vadd.f32 %v10078_v23, %v9989_v48 }
 0x126   :  { %v1534_v8 = vpop.f32.mrb[18].mxu0  ;;  %8592 = vmatprep.mubr.msk.f32.mxu1 %vm9198_vm0, %v9199_v11 }
 0x127   :  { %v1535_v10 = vadd.f32 %v10029_v6, %v1534_v8  ;;  %v1604_v12 = vpop.f32.mrb[18].mxu1  ;;  %v8255_v13 = vpop.f32.mrb[19].mxu0 }
 0x128   :  { %v1605_v15 = vadd.f32 %v10035_v7, %v1604_v12  ;;  %v8266_v16 = vpop.f32.mrb[19].mxu1  ;;  %v1165_v12 = vadd.f32 %v10114_v33, %v9993_v53  ;;  %v1235_v13 = vadd.f32 %v10120_v37, %v9995_v55  ;;  %v7607_v53 = vld [vmem:[%s10616_s2 + $0x11] ss:$0 sm:$0xff] }
 0x129   :  { %8586 = vmatpush3.xpose.msk.msra.mxu0 %vm3658_vm2, %v1535_v10 }
 0x12a   :  { %8591 = vmatpush3.xpose.msk.msra.mxu1 %vm3658_vm2, %v1605_v15  ;;  %8595 = vmatprep.subr.mxu0 %v9199_v11 }
 0x12b   :  { %8600 = vmatprep.subr.mxu1 %v9199_v11 }
 0x12c   :  { %8588 = vmatmul.mubr.msk.f32.vlgmr.msra.gmra.mrb[50].mxu0 %vm3658_vm2, %v322_v17 }
 0x12d   :  { %8593 = vmatmul.mubr.msk.f32.vlgmr.msra.gmra.mrb[50].mxu1 %vm3658_vm2, %v392_v19  ;;  %8597 = vmatprep.mubr.msk.f32.mxu0 %vm9198_vm0, %v9199_v11 }
 0x12e   :  { %v1674_v22 = vpop.f32.mrb[20].mxu0  ;;  %8602 = vmatprep.mubr.msk.f32.mxu1 %vm9198_vm0, %v9199_v11 }
 0x12f   :  { %v1675_v24 = vadd.f32 %v10063_v20, %v1674_v22  ;;  %v1744_v25 = vpop.f32.mrb[20].mxu1  ;;  %v8277_v26 = vpop.f32.mrb[21].mxu0 }
 0x130   :  { %v1745_v18 = vadd.f32 %v10069_v21, %v1744_v25  ;;  %v8288_v27 = vpop.f32.mrb[21].mxu1 }
 0x131   :  { %8596 = vmatpush3.xpose.msk.msra.mxu0 %vm3658_vm2, %v1675_v24 }
 0x132   :  { %8601 = vmatpush3.xpose.msk.msra.mxu1 %vm3658_vm2, %v1745_v18  ;;  %8605 = vmatprep.subr.mxu0 %v9199_v11 }
 0x133   :  { %8610 = vmatprep.subr.mxu1 %v9199_v11 }
 0x134   :  { %8598 = vmatmul.mubr.msk.f32.vlgmr.msra.gmra.mrb[52].mxu0 %vm3658_vm2, %v462_v28 }
 0x135   :  { %8603 = vmatmul.mubr.msk.f32.vlgmr.msra.gmra.mrb[52].mxu1 %vm3658_vm2, %v532_v29  ;;  %8607 = vmatprep.mubr.msk.f32.mxu0 %vm9198_vm0, %v9199_v11 }
 0x136   :  { %v1814_v32 = vpop.f32.mrb[22].mxu0  ;;  %8612 = vmatprep.mubr.msk.f32.mxu1 %vm9198_vm0, %v9199_v11 }
 0x137   :  { %v1815_v34 = vadd.f32 %v10099_v30, %v1814_v32  ;;  %v1884_v35 = vpop.f32.mrb[22].mxu1  ;;  %v8299_v51 = vpop.f32.mrb[23].mxu0 }
 0x138   :  { %v1885_v39 = vadd.f32 %v10105_v31, %v1884_v35  ;;  %v8310_v41 = vpop.f32.mrb[23].mxu1 }
 0x139   :  { %8606 = vmatpush3.xpose.msk.msra.mxu0 %vm3658_vm2, %v1815_v34 }
 0x13a   :  { %8611 = vmatpush3.xpose.msk.msra.mxu1 %vm3658_vm2, %v1885_v39  ;;  %8615 = vmatprep.subr.mxu0 %v9199_v11 }
 0x13b   :  { %8620 = vmatprep.subr.mxu1 %v9199_v11 }
 0x13c   :  { %8608 = vmatmul.mubr.msk.f32.vlgmr.msra.gmra.mrb[54].mxu0 %vm3658_vm2, %v602_v43 }
 0x13d   :  { %8613 = vmatmul.mubr.msk.f32.vlgmr.msra.gmra.mrb[54].mxu1 %vm3658_vm2, %v672_v45  ;;  %8617 = vmatprep.mubr.msk.f32.mxu0 %vm9198_vm0, %v9199_v11 }
 0x13e   :  { %v1954_v47 = vpop.f32.mrb[24].mxu0  ;;  %8622 = vmatprep.mubr.msk.f32.mxu1 %vm9198_vm0, %v9199_v11 }
 0x13f   :  { %v1955_v36 = vadd.f32 %v10000_v57, %v1954_v47  ;;  %v2024_v49 = vpop.f32.mrb[24].mxu1  ;;  %v8321_v52 = vpop.f32.mrb[25].mxu0 }
 0x140   :  { %v2025_v54 = vadd.f32 %v10005_v58, %v2024_v49  ;;  %v8332_v38 = vpop.f32.mrb[25].mxu1 }
 0x141   :  { %8616 = vmatpush3.xpose.msk.msra.mxu0 %vm3658_vm2, %v1955_v36 }
 0x142   :  { %8621 = vmatpush3.xpose.msk.msra.mxu1 %vm3658_vm2, %v2025_v54  ;;  %8625 = vmatprep.subr.mxu0 %v9199_v11 }
 0x143   :  { %8630 = vmatprep.subr.mxu1 %v9199_v11 }
 0x144   :  { %8618 = vmatmul.mubr.msk.f32.vlgmr.msra.gmra.mrb[56].mxu0 %vm3658_vm2, %v745_v56 }
 0x145   :  { %8623 = vmatmul.mubr.msk.f32.vlgmr.msra.gmra.mrb[56].mxu1 %vm3658_vm2, %v815_v59  ;;  %8627 = vmatprep.mubr.msk.f32.mxu0 %vm9198_vm0, %v9199_v11 }
 0x146   :  { %v2094_v57 = vpop.f32.mrb[26].mxu0  ;;  %8632 = vmatprep.mubr.msk.f32.mxu1 %vm9198_vm0, %v9199_v11 }
 0x147   :  { %v2095_v40 = vadd.f32 %v10029_v6, %v2094_v57  ;;  %v2164_v58 = vpop.f32.mrb[26].mxu1  ;;  %v8343_v60 = vpop.f32.mrb[27].mxu0  ;;  %v1095_v6 = vadd.f32 %v10084_v3, %v9991_v50 }
 0x148   :  { %v2165_v61 = vadd.f32 %v10035_v7, %v2164_v58  ;;  %v8354_v42 = vpop.f32.mrb[27].mxu1 }
 0x149   :  { %8626 = vmatpush3.xpose.msk.msra.mxu0 %vm3658_vm2, %v2095_v40 }
 0x14a   :  { %8631 = vmatpush3.xpose.msk.msra.mxu1 %vm3658_vm2, %v2165_v61  ;;  %8635 = vmatprep.subr.mxu0 %v9199_v11 }
 0x14b   :  { %8640 = vmatprep.subr.mxu1 %v9199_v11 }
 0x14c   :  { %8628 = vmatmul.mubr.msk.f32.vlgmr.msra.gmra.mrb[58].mxu0 %vm3658_vm2, %v885_v62 }
 0x14d   :  { %8633 = vmatmul.mubr.msk.f32.vlgmr.msra.gmra.mrb[58].mxu1 %vm3658_vm2, %v955_v63  ;;  %8637 = vmatprep.mubr.msk.f32.mxu0 %vm9198_vm0, %v9199_v11 }
 0x14e   :  { %v2234_v0 = vpop.f32.mrb[28].mxu0  ;;  %8642 = vmatprep.mubr.msk.f32.mxu1 %vm9198_vm0, %v9199_v11 }
 0x14f   :  { %v2235_v44 = vadd.f32 %v10063_v20, %v2234_v0  ;;  %v2304_v1 = vpop.f32.mrb[28].mxu1  ;;  %v8365_v2 = vpop.f32.mrb[29].mxu0 }
 0x150   :  { %v2305_v4 = vadd.f32 %v10069_v21, %v2304_v1  ;;  %v8376_v46 = vpop.f32.mrb[29].mxu1 }
 0x151   :  { %8636 = vmatpush3.xpose.msk.msra.mxu0 %vm3658_vm2, %v2235_v44 }
 0x152   :  { %8641 = vmatpush3.xpose.msk.msra.mxu1 %vm3658_vm2, %v2305_v4  ;;  %8645 = vmatprep.subr.mxu0 %v9199_v11 }
 0x153   :  { %8650 = vmatprep.subr.mxu1 %v9199_v11 }
 0x154   :  { %8638 = vmatmul.mubr.msk.f32.vlgmr.msra.gmra.mrb[60].mxu0 %vm3658_vm2, %v1025_v5 }
 0x155   :  { %8643 = vmatmul.mubr.msk.f32.vlgmr.msra.gmra.mrb[60].mxu1 %vm3658_vm2, %v1095_v6  ;;  %8647 = vmatprep.mubr.msk.f32.mxu0 %vm9198_vm0, %v9199_v11 }
 0x156   :  { %v2374_v7 = vpop.f32.mrb[30].mxu0  ;;  %8652 = vmatprep.mubr.msk.f32.mxu1 %vm9198_vm0, %v9199_v11 }
 0x157   :  { %v2375_v48 = vadd.f32 %v10099_v30, %v2374_v7  ;;  %v2444_v8 = vpop.f32.mrb[30].mxu1  ;;  %v8387_v9 = vpop.f32.mrb[31].mxu0 }
 0x158   :  { %v2445_v10 = vadd.f32 %v10105_v31, %v2444_v8  ;;  %v8398_v50 = vpop.f32.mrb[31].mxu1 }
 0x159   :  { %8646 = vmatpush3.xpose.msk.msra.mxu0 %vm3658_vm2, %v2375_v48 }
 0x15a   :  { %8651 = vmatpush3.xpose.msk.msra.mxu1 %vm3658_vm2, %v2445_v10  ;;  %8655 = vmatprep.subr.mxu0 %v9199_v11 }
 0x15b   :  { %8660 = vmatprep.subr.mxu1 %v9199_v11 }
 0x15c   :  { %8648 = vmatmul.mubr.msk.f32.vlgmr.msra.gmra.mrb[62].mxu0 %vm3658_vm2, %v1165_v12 }
 0x15d   :  { %8653 = vmatmul.mubr.msk.f32.vlgmr.msra.gmra.mrb[62].mxu1 %vm3658_vm2, %v1235_v13  ;;  %8657 = vmatprep.mubr.msk.f32.mxu0 %vm9198_vm0, %v9199_v11 }
 0x15e   :  { %v2604_v15 = vpop.f32.mrb[32].mxu0  ;;  %8662 = vmatprep.mubr.msk.f32.mxu1 %vm9198_vm0, %v9199_v11 }
 0x15f   :  { %v2605_v55 = vadd.f32 %v7606_v14, %v2604_v15  ;;  %v8409_v16 = vpop.f32.mrb[33].mxu0  ;;  %v2674_v17 = vpop.f32.mrb[32].mxu1 }
 0x160   :  { %v2675_v19 = vadd.f32 %v7607_v53, %v2674_v17  ;;  %v8420_v20 = vpop.f32.mrb[33].mxu1 }
 0x161   :  { %8656 = vmatpush3.msra.mxu0 %v2605_v55 }
 0x162   :  { %8661 = vmatpush3.msra.mxu1 %v2675_v19  ;;  %8665 = vmatprep.subr.mxu0 %v9199_v11 }
 0x163   :  { %8670 = vmatprep.subr.mxu1 %v9199_v11 }
 0x166   :  { %v10209_v21 = vpop.f32.mrb[34].mxu0 }
 0x167   :  { %v8431_v22 = vpop.f32.mrb[35].mxu0  ;;  %v10211_v23 = vpop.f32.mrb[34].mxu1 }
 0x168   :  { %v8442_v24 = vpop.f32.mrb[35].mxu1 }
 0x16e   :  { %v10213_v25 = vpop.f32.mrb[36].mxu0 }
 0x16f   :  { %v8453_v26 = vpop.f32.mrb[37].mxu0  ;;  %v10215_v3 = vpop.f32.mrb[36].mxu1 }
 0x170   :  { %v8464_v18 = vpop.f32.mrb[37].mxu1 }
 0x176   :  { %v10217_v27 = vpop.f32.mrb[38].mxu0 }
 0x177   :  { %v8475_v28 = vpop.f32.mrb[39].mxu0  ;;  %v10219_v29 = vpop.f32.mrb[38].mxu1 }
 0x178   :  { %v8486_v30 = vpop.f32.mrb[39].mxu1 }
 0x17e   :  { %v3164_v31 = vpop.f32.mrb[40].mxu0 }
 0x17f   :  { %v10221_v32 = vadd.f32 %v7606_v14, %v3164_v31  ;;  %v3234_v33 = vpop.f32.mrb[40].mxu1  ;;  %v8497_v34 = vpop.f32.mrb[41].mxu0 }
 0x180   :  { %v10223_v35 = vadd.f32 %v7607_v53, %v3234_v33  ;;  %v8508_v51 = vpop.f32.mrb[41].mxu1 }
 0x186   :  { %v10225_v37 = vpop.f32.mrb[42].mxu0 }
 0x187   :  { %v10227_v39 = vpop.f32.mrb[42].mxu1  ;;  %v8519_v41 = vpop.f32.mrb[43].mxu0 }
 0x188   :  { %v8530_v43 = vpop.f32.mrb[43].mxu1 }
 0x18e   :  { %v10229_v45 = vpop.f32.mrb[44].mxu0 }
 0x18f   :  { %v10231_v47 = vpop.f32.mrb[44].mxu1  ;;  %v8541_v36 = vpop.f32.mrb[45].mxu0 }
 0x190   :  { %v8552_v49 = vpop.f32.mrb[45].mxu1 }
 0x196   :  { %v10233_v52 = vpop.f32.mrb[46].mxu0 }
 0x197   :  { %v10235_v54 = vpop.f32.mrb[46].mxu1  ;;  %v8563_v38 = vpop.f32.mrb[47].mxu0 }
 0x198   :  { %v8574_v56 = vpop.f32.mrb[47].mxu1 }
 0x1f7   :  { %v10237_v59 = vpop.f32.mrb[48].mxu0 }
 0x1f8   :  { %v10239_v57 = vpop.f32.mrb[48].mxu1  ;;  %v8579_v40 = vpop.f32.mrb[49].mxu0  ;;  %v4876_v58 = vsel %vm4875_vm3, %v10237_v59, -inf }
 0x1f9   :  { %v8584_v60 = vpop.f32.mrb[49].mxu1  ;;  %4877 = vmax.xlane.f32.xlu0 %v4876_v58  ;;  %v4879_v61 = vsel %vm4875_vm3, %v10239_v57, -inf }
 0x1fd   :  { %4880 = vmax.xlane.f32.xlu0 %v4879_v61 }
 0x1ff   :  { %v10245_v42 = vpop.f32.mrb[50].mxu0 }
 0x200   :  { %v10247_v62 = vpop.f32.mrb[50].mxu1  ;;  %v8589_v63 = vpop.f32.mrb[51].mxu0  ;;  %v4882_v0 = vsel %vm4875_vm3, %v10245_v42, -inf }
 0x201   :  { %v8594_v44 = vpop.f32.mrb[51].mxu1  ;;  %4883 = vmax.xlane.f32.xlu1 %v4882_v0  ;;  %v4885_v1 = vsel %vm4875_vm3, %v10247_v62, -inf }
 0x205   :  { %4886 = vmax.xlane.f32.xlu1 %v4885_v1 }
 0x207   :  { %v10253_v2 = vpop.f32.mrb[52].mxu0 }
 0x208   :  { %v10255_v4 = vpop.f32.mrb[52].mxu1  ;;  %v8599_v46 = vpop.f32.mrb[53].mxu0  ;;  %v4888_v5 = vsel %vm4875_vm3, %v10253_v2, -inf }
 0x209   :  { %v8604_v6 = vpop.f32.mrb[53].mxu1  ;;  %v4891_v7 = vsel %vm4875_vm3, %v10255_v4, -inf  ;;  %4889 = vmax.xlane.f32.xlu0 %v4888_v5  ;;  %v10307_v46 = vld [vmem:[%s10616_s2 + $0x12] ss:$0 sm:$0xff] }
 0x20a   :  { %4892 = vmax.xlane.f32.xlu1 %v4891_v7  ;;  %v2745_v7 = vadd.f32 %v10307_v46, %v10209_v21 }
 0x20f   :  { %v10261_v48 = vpop.f32.mrb[54].mxu0 }
 0x210   :  { %v10263_v8 = vpop.f32.mrb[54].mxu1  ;;  %v8609_v9 = vpop.f32.mrb[55].mxu0  ;;  %v4894_v10 = vsel %vm4875_vm3, %v10261_v48, -inf }
 0x211   :  { %v8614_v50 = vpop.f32.mrb[55].mxu1  ;;  %v4897_v12 = vsel %vm4875_vm3, %v10263_v8, -inf  ;;  %4895 = vmax.xlane.f32.xlu0 %v4894_v10  ;;  %v10315_v9 = vld [vmem:[%s10616_s2 + $0x13] ss:$0 sm:$0xff] }
 0x212   :  { %4898 = vmax.xlane.f32.xlu1 %v4897_v12 }
 0x217   :  { %v10269_v13 = vpop.f32.mrb[56].mxu0 }
 0x218   :  { %v10271_v14 = vpop.f32.mrb[56].mxu1  ;;  %v8619_v53 = vpop.f32.mrb[57].mxu0  ;;  %v4900_v15 = vsel %vm4875_vm3, %v10269_v13, -inf }
 0x219   :  { %v8624_v55 = vpop.f32.mrb[57].mxu1  ;;  %v4903_v16 = vsel %vm4875_vm3, %v10271_v14, -inf  ;;  %4901 = vmax.xlane.f32.xlu0 %v4900_v15  ;;  %v2815_v53 = vadd.f32 %v10315_v9, %v10211_v23 }
 0x21a   :  { %4904 = vmax.xlane.f32.xlu1 %v4903_v16  ;;  %v10329_v55 = vld [vmem:[%s10616_s2 + $0x14] ss:$0 sm:$0xff] }
 0x21f   :  { %v10277_v17 = vpop.f32.mrb[58].mxu0 }
 0x220   :  { %v10279_v19 = vpop.f32.mrb[58].mxu1  ;;  %v8629_v20 = vpop.f32.mrb[59].mxu0  ;;  %v4906_v22 = vsel %vm4875_vm3, %v10277_v17, -inf }
 0x221   :  { %v8634_v24 = vpop.f32.mrb[59].mxu1  ;;  %v4909_v26 = vsel %vm4875_vm3, %v10279_v19, -inf  ;;  %4907 = vmax.xlane.f32.xlu0 %v4906_v22  ;;  %v10341_v20 = vld [vmem:[%s10616_s2 + $0x15] ss:$0 sm:$0xff] }
 0x222   :  { %4910 = vmax.xlane.f32.xlu1 %v4909_v26 }
 0x227   :  { %v10285_v18 = vpop.f32.mrb[60].mxu0 }
 0x228   :  { %v10287_v28 = vpop.f32.mrb[60].mxu1  ;;  %v8639_v30 = vpop.f32.mrb[61].mxu0  ;;  %v4912_v31 = vsel %vm4875_vm3, %v10285_v18, -inf }
 0x229   :  { %v8644_v33 = vpop.f32.mrb[61].mxu1  ;;  %v4915_v34 = vsel %vm4875_vm3, %v10287_v28, -inf  ;;  %4913 = vmax.xlane.f32.xlu0 %v4912_v31 }
 0x22a   :  { %4916 = vmax.xlane.f32.xlu1 %v4915_v34  ;;  %v2955_v33 = vadd.f32 %v10341_v20, %v10215_v3 }
 0x22f   :  { %v10293_v51 = vpop.f32.mrb[62].mxu0 }
 0x230   :  { %v10295_v41 = vpop.f32.mrb[62].mxu1  ;;  %v8649_v43 = vpop.f32.mrb[63].mxu0  ;;  %v4918_v36 = vsel %vm4875_vm3, %v10293_v51, -inf }
 0x231   :  { %v8654_v49 = vpop.f32.mrb[63].mxu1  ;;  %v4921_v38 = vsel %vm4875_vm3, %v10295_v41, -inf  ;;  %4919 = vmax.xlane.f32.xlu0 %v4918_v36  ;;  %v10355_v43 = vld [vmem:[%s10616_s2 + $0x16] ss:$0 sm:$0xff] }
 0x232   :  { %4922 = vmax.xlane.f32.xlu1 %v4921_v38  ;;  %v3025_v49 = vadd.f32 %v10355_v43, %v10217_v27 }
 0x286   :  { %v4878_v56 = vpop.xlane.xlu0 %4877 }
 0x287   :  { %v4924_v40 = vsub.f32 %v10237_v59, %v4878_v56 }
 0x289   :  { %v4940_v58 = vmul.f32 1.442695, %v4924_v40 }
 0x28a   :  { %v4881_v60 = vpop.xlane.xlu0 %4880 }
 0x28b   :  { %9109 = vpow2.f32 %v4940_v58  ;;  %v4925_v61 = vsub.f32 %v10239_v57, %v4881_v60 }
 0x28d   :  { %v4942_v63 = vmul.f32 1.442695, %v4925_v61 }
 0x28e   :  { %v4884_v0 = vpop.xlane.xlu1 %4883 }
 0x28f   :  { %9111 = vpow2.f32 %v4942_v63  ;;  %v4926_v44 = vsub.f32 %v10245_v42, %v4884_v0 }
 0x291   :  { %v4944_v1 = vmul.f32 1.442695, %v4926_v44 }
 0x292   :  { %v4887_v5 = vpop.xlane.xlu1 %4886 }
 0x293   :  { %9113 = vpow2.f32 %v4944_v1  ;;  %v4927_v59 = vsub.f32 %v10247_v62, %v4887_v5 }
 0x295   :  { %v9110_v6 = vpop.eup %9109  ;;  %v4946_v57 = vmul.f32 1.442695, %v4927_v59 }
 0x296   :  { %8658 = vmatmul.mubr.msk.f32.vlgmr.msra.gmra.mrb[64].mxu0 %vm4875_vm3, %v9110_v6  ;;  %v4890_v42 = vpop.xlane.xlu0 %4889  ;;  %v4972_v10 = vsel %vm4875_vm3, %v9110_v6, 0.0 }
 0x297   :  { %9115 = vpow2.f32 %v4946_v57  ;;  %8666 = vmatpush3.msra.mxu0 %v2745_v7  ;;  %v4893_v50 = vpop.xlane.xlu1 %4892  ;;  %v4928_v62 = vsub.f32 %v10253_v2, %v4890_v42  ;;  %4973 = vadd.xlane.f32.xlu0 %v4972_v10 }
 0x298   :  { %v4929_v12 = vsub.f32 %v10255_v4, %v4893_v50  ;;  %8667 = vmatprep.mubr.msk.f32.mxu0 %vm9198_vm0, %v9199_v11  ;;  %8675 = vmatprep.subr.mxu0 %v9199_v11  ;;  %v2885_v4 = vadd.f32 %v10329_v55, %v10213_v25 }
 0x299   :  { %v9112_v21 = vpop.eup %9111  ;;  %v4948_v15 = vmul.f32 1.442695, %v4928_v62 }
 0x29a   :  { %v4950_v16 = vmul.f32 1.442695, %v4929_v12  ;;  %8663 = vmatmul.mubr.msk.f32.vlgmr.msra.gmra.mrb[64].mxu1 %vm4875_vm3, %v9112_v21  ;;  %v4975_v2 = vsel %vm4875_vm3, %v9112_v21, 0.0 }
 0x29b   :  { %9117 = vpow2.f32 %v4948_v15  ;;  %8671 = vmatpush3.msra.mxu1 %v2815_v53  ;;  %4976 = vadd.xlane.f32.xlu1 %v4975_v2  ;;  %v3515_v53 = vadd.f32 %v10341_v20, %v10231_v47 }
 0x29c   :  { %9119 = vpow2.f32 %v4950_v16  ;;  %8672 = vmatprep.mubr.msk.f32.mxu1 %vm9198_vm0, %v9199_v11  ;;  %8680 = vmatprep.subr.mxu1 %v9199_v11 }
 0x29d   :  { %v9114_v23 = vpop.eup %9113 }
 0x29e   :  { %8668 = vmatmul.mubr.msk.f32.vlgmr.msra.gmra.mrb[66].mxu0 %vm4875_vm3, %v9114_v23  ;;  %v4896_v22 = vpop.xlane.xlu0 %4895  ;;  %v4978_v24 = vsel %vm4875_vm3, %v9114_v23, 0.0 }
 0x29f   :  { %8676 = vmatpush3.msra.mxu0 %v2885_v4  ;;  %v4899_v26 = vpop.xlane.xlu1 %4898  ;;  %v4930_v30 = vsub.f32 %v10261_v48, %v4896_v22  ;;  %4979 = vadd.xlane.f32.xlu0 %v4978_v24 }
 0x2a0   :  { %v4931_v31 = vsub.f32 %v10263_v8, %v4899_v26  ;;  %8677 = vmatprep.mubr.msk.f32.mxu0 %vm9198_vm0, %v9199_v11  ;;  %8685 = vmatprep.subr.mxu0 %v9199_v11  ;;  %v10362_v8 = vld [vmem:[%s10616_s2 + $0x17] ss:$0 sm:$0xff] }
 0x2a1   :  { %v9116_v25 = vpop.eup %9115  ;;  %v4952_v34 = vmul.f32 1.442695, %v4930_v30  ;;  %v3095_v56 = vadd.f32 %v10362_v8, %v10219_v29  ;;  %v3655_v22 = vadd.f32 %v10362_v8, %v10235_v54 }
 0x2a2   :  { %v4954_v36 = vmul.f32 1.442695, %v4931_v31  ;;  %8673 = vmatmul.mubr.msk.f32.vlgmr.msra.gmra.mrb[66].mxu1 %vm4875_vm3, %v9116_v25  ;;  %v4981_v48 = vsel %vm4875_vm3, %v9116_v25, 0.0  ;;  %v10454_v25 = vld [vmem:[%s10617_s3] sm:$0xf] }
 0x2a3   :  { %9121 = vpow2.f32 %v4952_v34  ;;  %8681 = vmatpush3.msra.mxu1 %v2955_v33  ;;  %4982 = vadd.xlane.f32.xlu1 %v4981_v48  ;;  %v10462_v33 = vld [vmem:[%s10617_s3 + $0x4] sm:$0xf] }
 0x2a4   :  { %9123 = vpow2.f32 %v4954_v36  ;;  %8682 = vmatprep.mubr.msk.f32.mxu1 %vm9198_vm0, %v9199_v11  ;;  %8690 = vmatprep.subr.mxu1 %v9199_v11 }
 0x2a5   :  { %v9118_v3 = vpop.eup %9117 }
 0x2a6   :  { %v9120_v38 = vpop.eup %9119  ;;  %8678 = vmatmul.mubr.msk.f32.vlgmr.msra.gmra.mrb[68].mxu0 %vm4875_vm3, %v9118_v3  ;;  %v4902_v40 = vpop.xlane.xlu0 %4901  ;;  %v4984_v58 = vsel %vm4875_vm3, %v9118_v3, 0.0 }
 0x2a7   :  { %8683 = vmatmul.mubr.msk.f32.vlgmr.msra.gmra.mrb[68].mxu1 %vm4875_vm3, %v9120_v38  ;;  %v4905_v60 = vpop.xlane.xlu1 %4904  ;;  %8686 = vmatpush3.msra.mxu0 %v3025_v49  ;;  %v4932_v61 = vsub.f32 %v10269_v13, %v4902_v40  ;;  %v4987_v63 = vsel %vm4875_vm3, %v9120_v38, 0.0 }
 0x2a8   :  { %8691 = vmatpush3.msra.mxu1 %v3095_v56  ;;  %v4933_v27 = vsub.f32 %v10271_v14, %v4905_v60  ;;  %4988 = vadd.xlane.f32.xlu1 %v4987_v63  ;;  %v10470_v56 = vld [vmem:[%s10617_s3 + $0x8] sm:$0xf] }
 0x2a9   :  { %v4956_v0 = vmul.f32 1.442695, %v4932_v61  ;;  %4985 = vadd.xlane.f32.xlu0 %v4984_v58  ;;  %8687 = vmatprep.mubr.msk.f32.mxu0 %vm9198_vm0, %v9199_v11 }
 0x2aa   :  { %v4958_v29 = vmul.f32 1.442695, %v4933_v27  ;;  %8692 = vmatprep.mubr.msk.f32.mxu1 %vm9198_vm0, %v9199_v11  ;;  %8695 = vmatprep.subr.mxu0 %v9199_v11 }
 0x2ab   :  { %9125 = vpow2.f32 %v4956_v0  ;;  %8700 = vmatprep.subr.mxu1 %v9199_v11  ;;  %v10480_v0 = vld [vmem:[%s10617_s3 + $0xc] sm:$0xf] }
 0x2ac   :  { %9127 = vpow2.f32 %v4958_v29 }
 0x2ad   :  { %v9122_v13 = vpop.eup %9121 }
 0x2ae   :  { %v9124_v44 = vpop.eup %9123  ;;  %8688 = vmatmul.mubr.msk.f32.vlgmr.msra.gmra.mrb[70].mxu0 %vm4875_vm3, %v9122_v13  ;;  %v4908_v14 = vpop.xlane.xlu0 %4907  ;;  %v4990_v1 = vsel %vm4875_vm3, %v9122_v13, 0.0 }
 0x2af   :  { %8693 = vmatmul.mubr.msk.f32.vlgmr.msra.gmra.mrb[70].mxu1 %vm4875_vm3, %v9124_v44  ;;  %v4911_v5 = vpop.xlane.xlu1 %4910  ;;  %8696 = vmatpush3.msra.mxu0 %v10221_v32  ;;  %v4934_v59 = vsub.f32 %v10277_v17, %v4908_v14  ;;  %v4993_v6 = vsel %vm4875_vm3, %v9124_v44, 0.0 }
 0x2b0   :  { %8701 = vmatpush3.msra.mxu1 %v10223_v35  ;;  %v4935_v7 = vsub.f32 %v10279_v19, %v4911_v5  ;;  %4994 = vadd.xlane.f32.xlu1 %v4993_v6  ;;  %v3305_v35 = vadd.f32 %v10307_v46, %v10225_v37  ;;  %v3375_v19 = vadd.f32 %v10315_v9, %v10227_v39 }
 0x2b1   :  { %v4960_v57 = vmul.f32 1.442695, %v4934_v59  ;;  %4991 = vadd.xlane.f32.xlu0 %v4990_v1  ;;  %8697 = vmatprep.mubr.msk.f32.mxu0 %vm9198_vm0, %v9199_v11  ;;  %v10492_v1 = vld [vmem:[%s10617_s3 + $0x10] sm:$0xf] }
 0x2b2   :  { %v4962_v42 = vmul.f32 1.442695, %v4935_v7  ;;  %8702 = vmatprep.mubr.msk.f32.mxu1 %vm9198_vm0, %v9199_v11  ;;  %8705 = vmatprep.subr.mxu0 %v9199_v11 }
 0x2b3   :  { %9129 = vpow2.f32 %v4960_v57  ;;  %8710 = vmatprep.subr.mxu1 %v9199_v11 }
 0x2b4   :  { %9131 = vpow2.f32 %v4962_v42 }
 0x2b5   :  { %v9126_v32 = vpop.eup %9125 }
 0x2b6   :  { %v9128_v17 = vpop.eup %9127  ;;  %8698 = vmatmul.mubr.msk.f32.vlgmr.msra.gmra.mrb[72].mxu0 %vm4875_vm3, %v9126_v32  ;;  %v4914_v10 = vpop.xlane.xlu0 %4913  ;;  %v4996_v50 = vsel %vm4875_vm3, %v9126_v32, 0.0  ;;  %v10502_v32 = vld [vmem:[%s10617_s3 + $0x14] sm:$0xf] }
 0x2b7   :  { %8703 = vmatmul.mubr.msk.f32.vlgmr.msra.gmra.mrb[72].mxu1 %vm4875_vm3, %v9128_v17  ;;  %v4917_v62 = vpop.xlane.xlu1 %4916  ;;  %8706 = vmatpush3.msra.mxu0 %v3305_v35  ;;  %v4936_v12 = vsub.f32 %v10285_v18, %v4914_v10  ;;  %v4999_v21 = vsel %vm4875_vm3, %v9128_v17, 0.0 }
 0x2b8   :  { %8711 = vmatpush3.msra.mxu1 %v3375_v19  ;;  %v4937_v37 = vsub.f32 %v10287_v28, %v4917_v62  ;;  %5000 = vadd.xlane.f32.xlu1 %v4999_v21  ;;  %v3445_v28 = vadd.f32 %v10329_v55, %v10229_v45 }
 0x2b9   :  { %v4964_v46 = vmul.f32 1.442695, %v4936_v12  ;;  %4997 = vadd.xlane.f32.xlu0 %v4996_v50  ;;  %8707 = vmatprep.mubr.msk.f32.mxu0 %vm9198_vm0, %v9199_v11  ;;  %v10514_v12 = vld [vmem:[%s10617_s3 + $0x18] sm:$0xf] }
 0x2ba   :  { %v4966_v39 = vmul.f32 1.442695, %v4937_v37  ;;  %8712 = vmatprep.mubr.msk.f32.mxu1 %vm9198_vm0, %v9199_v11  ;;  %8715 = vmatprep.subr.mxu0 %v9199_v11 }
 0x2bb   :  { %9133 = vpow2.f32 %v4964_v46  ;;  %8720 = vmatprep.subr.mxu1 %v9199_v11  ;;  %v10519_v46 = vld [vmem:[%s10617_s3 + $0x1c] sm:$0xf] }
 0x2bc   :  { %9135 = vpow2.f32 %v4966_v39 }
 0x2bd   :  { %v9130_v18 = vpop.eup %9129 }
 0x2be   :  { %v9132_v9 = vpop.eup %9131  ;;  %8708 = vmatmul.mubr.msk.f32.vlgmr.msra.gmra.mrb[74].mxu0 %vm4875_vm3, %v9130_v18  ;;  %v4920_v15 = vpop.xlane.xlu0 %4919  ;;  %v5002_v16 = vsel %vm4875_vm3, %v9130_v18, 0.0 }
 0x2bf   :  { %8713 = vmatmul.mubr.msk.f32.vlgmr.msra.gmra.mrb[74].mxu1 %vm4875_vm3, %v9132_v9  ;;  %v4923_v2 = vpop.xlane.xlu1 %4922  ;;  %8716 = vmatpush3.msra.mxu0 %v3445_v28  ;;  %v4938_v23 = vsub.f32 %v10293_v51, %v4920_v15  ;;  %v5005_v4 = vsel %vm4875_vm3, %v9132_v9, 0.0 }
 0x2c0   :  { %8721 = vmatpush3.msra.mxu1 %v3515_v53  ;;  %v4939_v45 = vsub.f32 %v10295_v41, %v4923_v2  ;;  %5006 = vadd.xlane.f32.xlu1 %v5005_v4  ;;  %v3585_v41 = vadd.f32 %v10355_v43, %v10233_v52 }
 0x2c1   :  { %v4968_v55 = vmul.f32 1.442695, %v4938_v23  ;;  %5003 = vadd.xlane.f32.xlu0 %v5002_v16  ;;  %8717 = vmatprep.mubr.msk.f32.mxu0 %vm9198_vm0, %v9199_v11 }
 0x2c2   :  { %v4970_v47 = vmul.f32 1.442695, %v4939_v45  ;;  %8722 = vmatprep.mubr.msk.f32.mxu1 %vm9198_vm0, %v9199_v11  ;;  %8725 = vmatprep.subr.mxu0 %v9199_v11 }
 0x2c3   :  { %9137 = vpow2.f32 %v4968_v55  ;;  %8730 = vmatprep.subr.mxu1 %v9199_v11 }
 0x2c4   :  { %9139 = vpow2.f32 %v4970_v47 }
 0x2c5   :  { %v9134_v51 = vpop.eup %9133 }
 0x2c6   :  { %v9136_v20 = vpop.eup %9135  ;;  %8718 = vmatmul.mubr.msk.f32.vlgmr.msra.gmra.mrb[76].mxu0 %vm4875_vm3, %v9134_v51  ;;  %v5008_v24 = vsel %vm4875_vm3, %v9134_v51, 0.0 }
 0x2c7   :  { %8723 = vmatmul.mubr.msk.f32.vlgmr.msra.gmra.mrb[76].mxu1 %vm4875_vm3, %v9136_v20  ;;  %8726 = vmatpush3.msra.mxu0 %v3585_v41  ;;  %v5011_v26 = vsel %vm4875_vm3, %v9136_v20, 0.0 }
 0x2c8   :  { %8731 = vmatpush3.msra.mxu1 %v3655_v22  ;;  %5012 = vadd.xlane.f32.xlu1 %v5011_v26 }
 0x2c9   :  { %5009 = vadd.xlane.f32.xlu0 %v5008_v24  ;;  %8727 = vmatprep.mubr.msk.f32.mxu0 %vm9198_vm0, %v9199_v11 }
 0x2ca   :  { %8732 = vmatprep.mubr.msk.f32.mxu1 %vm9198_vm0, %v9199_v11  ;;  %8735 = vmatprep.subr.mxu0 %v9199_v11 }
 0x2cb   :  { %8740 = vmatprep.subr.mxu1 %v9199_v11 }
 0x2cd   :  { %v9138_v52 = vpop.eup %9137 }
 0x2ce   :  { %v9140_v54 = vpop.eup %9139  ;;  %8728 = vmatmul.mubr.msk.f32.vlgmr.msra.gmra.mrb[78].mxu0 %vm4875_vm3, %v9138_v52  ;;  %v5014_v30 = vsel %vm4875_vm3, %v9138_v52, 0.0 }
 0x2cf   :  { %8733 = vmatmul.mubr.msk.f32.vlgmr.msra.gmra.mrb[78].mxu1 %vm4875_vm3, %v9140_v54  ;;  %v5017_v31 = vsel %vm4875_vm3, %v9140_v54, 0.0  ;;  %5015 = vadd.xlane.f32.xlu0 %v5014_v30 }
 0x2d0   :  { %5018 = vadd.xlane.f32.xlu1 %v5017_v31  ;;  %8737 = vmatprep.mubr.msk.f32.mxu0 %vm9198_vm0, %v9199_v11 }
 0x2d1   :  { %8742 = vmatprep.mubr.msk.f32.mxu1 %vm9198_vm0, %v9199_v11  ;;  %8736 = vmatpush3.msk.msra.mxu0 %vm6231_vm4, %v10454_v25 }
 0x2d2   :  { %8745 = vmatprep.subr.mxu0 %v9199_v11  ;;  %8741 = vmatpush3.msk.msra.mxu1 %vm6231_vm4, %v10462_v33 }
 0x2d3   :  { %8750 = vmatprep.subr.mxu1 %v9199_v11 }
 0x324   :  { %v4974_v34 = vpop.xlane.xlu0 %4973 }
 0x325   :  { %9141 = vrcp.f32 %v4974_v34 }
 0x328   :  { %v4977_v43 = vpop.xlane.xlu1 %4976 }
 0x329   :  { %9143 = vrcp.f32 %v4977_v43 }
 0x32c   :  { %v4980_v36 = vpop.xlane.xlu0 %4979 }
 0x32d   :  { %9145 = vrcp.f32 %v4980_v36 }
 0x32f   :  { %v9142_v8 = vpop.eup %9141 }
 0x330   :  { %v4983_v48 = vpop.xlane.xlu1 %4982 }
 0x331   :  { %9147 = vrcp.f32 %v4983_v48 }
 0x333   :  { %v9144_v58 = vpop.eup %9143 }
 0x335   :  { %v4989_v60 = vpop.xlane.xlu1 %4988 }
 0x336   :  { %v4986_v40 = vpop.xlane.xlu0 %4985 }
 0x337   :  { %9149 = vrcp.f32 %v4986_v40  ;;  %v9146_v29 = vpop.eup %9145 }
 0x338   :  { %9151 = vrcp.f32 %v4989_v60 }
 0x33b   :  { %v9148_v59 = vpop.eup %9147 }
 0x33d   :  { %v4995_v6 = vpop.xlane.xlu1 %4994 }
 0x33e   :  { %v4992_v5 = vpop.xlane.xlu0 %4991 }
 0x33f   :  { %9153 = vrcp.f32 %v4992_v5 }
 0x340   :  { %9155 = vrcp.f32 %v4995_v6 }
 0x341   :  { %v9150_v35 = vpop.eup %9149 }
 0x342   :  { %v9152_v19 = vpop.eup %9151 }
 0x345   :  { %v5001_v18 = vpop.xlane.xlu1 %5000 }
 0x346   :  { %v4998_v39 = vpop.xlane.xlu0 %4997 }
 0x347   :  { %9157 = vrcp.f32 %v4998_v39 }
 0x348   :  { %9159 = vrcp.f32 %v5001_v18 }
 0x349   :  { %v9154_v28 = vpop.eup %9153 }
 0x34a   :  { %v9156_v53 = vpop.eup %9155 }
 0x34d   :  { %v5007_v55 = vpop.xlane.xlu1 %5006 }
 0x34e   :  { %v5004_v45 = vpop.xlane.xlu0 %5003 }
 0x34f   :  { %9161 = vrcp.f32 %v5004_v45 }
 0x350   :  { %9163 = vrcp.f32 %v5007_v55 }
 0x351   :  { %v9158_v47 = vpop.eup %9157 }
 0x352   :  { %v9160_v41 = vpop.eup %9159 }
 0x355   :  { %v5013_v30 = vpop.xlane.xlu1 %5012 }
 0x356   :  { %v5010_v54 = vpop.xlane.xlu0 %5009 }
 0x357   :  { %9165 = vrcp.f32 %v5010_v54 }
 0x358   :  { %9167 = vrcp.f32 %v5013_v30 }
 0x359   :  { %v9162_v31 = vpop.eup %9161 }
 0x369   :  { %v5089_v3 = vpop.f32.mrb[64].mxu0 }
 0x36a   :  { %v6204_v49 = vmul.f32 %v9142_v8, %v5089_v3  ;;  %v8659_v38 = vpop.f32.mrb[65].mxu0  ;;  %v5016_v3 = vpop.xlane.xlu0 %5015 }
 0x36b   :  { %9169 = vrcp.f32 %v5016_v3 }
 0x36c   :  { %8738 = vmatmul.mubr.msk.f32.vlgmr.msra.gmra.mrb[80].mxu0 %vm3658_vm2, %v6204_v49  ;;  %v5019_v49 = vpop.xlane.xlu1 %5018 }
 0x36d   :  { %v5162_v61 = vpop.f32.mrb[64].mxu1  ;;  %8746 = vmatpush3.msk.msra.mxu0 %vm6231_vm4, %v10470_v56  ;;  %8747 = vmatprep.mubr.msk.f32.mxu0 %vm9198_vm0, %v9199_v11  ;;  %9171 = vrcp.f32 %v5019_v49 }
 0x36e   :  { %v6205_v63 = vmul.f32 %v9144_v58, %v5162_v61  ;;  %v8664_v27 = vpop.f32.mrb[65].mxu1  ;;  %8755 = vmatprep.subr.mxu0 %v9199_v11 }
 0x370   :  { %8743 = vmatmul.mubr.msk.f32.vlgmr.msra.gmra.mrb[80].mxu1 %vm3658_vm2, %v6205_v63 }
 0x371   :  { %v5235_v13 = vpop.f32.mrb[66].mxu0  ;;  %8751 = vmatpush3.msk.msra.mxu1 %vm6231_vm4, %v10480_v0  ;;  %8752 = vmatprep.mubr.msk.f32.mxu1 %vm9198_vm0, %v9199_v11 }
 0x372   :  { %v6206_v44 = vmul.f32 %v9146_v29, %v5235_v13  ;;  %v8669_v14 = vpop.f32.mrb[67].mxu0  ;;  %8760 = vmatprep.subr.mxu1 %v9199_v11 }
 0x374   :  { %8748 = vmatmul.mubr.msk.f32.vlgmr.msra.gmra.mrb[82].mxu0 %vm3658_vm2, %v6206_v44 }
 0x375   :  { %v5308_v7 = vpop.f32.mrb[66].mxu1  ;;  %8756 = vmatpush3.msk.msra.mxu0 %vm6231_vm4, %v10492_v1  ;;  %8757 = vmatprep.mubr.msk.f32.mxu0 %vm9198_vm0, %v9199_v11 }
 0x376   :  { %v6207_v57 = vmul.f32 %v9148_v59, %v5308_v7  ;;  %v8674_v42 = vpop.f32.mrb[67].mxu1  ;;  %8765 = vmatprep.subr.mxu0 %v9199_v11 }
 0x378   :  { %8753 = vmatmul.mubr.msk.f32.vlgmr.msra.gmra.mrb[82].mxu1 %vm3658_vm2, %v6207_v57 }
 0x379   :  { %v5381_v17 = vpop.f32.mrb[68].mxu0  ;;  %8761 = vmatpush3.msk.msra.mxu1 %vm6231_vm4, %v10502_v32  ;;  %8762 = vmatprep.mubr.msk.f32.mxu1 %vm9198_vm0, %v9199_v11 }
 0x37a   :  { %v6208_v10 = vmul.f32 %v9150_v35, %v5381_v17  ;;  %v5454_v50 = vpop.f32.mrb[68].mxu1  ;;  %v8679_v62 = vpop.f32.mrb[69].mxu0  ;;  %8770 = vmatprep.subr.mxu1 %v9199_v11 }
 0x37b   :  { %v6209_v21 = vmul.f32 %v9152_v19, %v5454_v50  ;;  %v8684_v37 = vpop.f32.mrb[69].mxu1 }
 0x37c   :  { %8758 = vmatmul.mubr.msk.f32.vlgmr.msra.gmra.mrb[84].mxu0 %vm3658_vm2, %v6208_v10 }
 0x37d   :  { %8763 = vmatmul.mubr.msk.f32.vlgmr.msra.gmra.mrb[84].mxu1 %vm3658_vm2, %v6209_v21  ;;  %8766 = vmatpush3.msk.msra.mxu0 %vm6231_vm4, %v10514_v12 }
 0x37e   :  { %8767 = vmatprep.mubr.msk.f32.mxu0 %vm9198_vm0, %v9199_v11  ;;  %8771 = vmatpush3.msk.msra.mxu1 %vm6231_vm4, %v10519_v46 }
 0x37f   :  { %8772 = vmatprep.mubr.msk.f32.mxu1 %vm9198_vm0, %v9199_v11  ;;  %8775 = vmatprep.subr.mxu0 %v9199_v11 }
 0x380   :  { %8780 = vmatprep.subr.mxu1 %v9199_v11 }
 0x381   :  { %v5527_v9 = vpop.f32.mrb[70].mxu0 }
 0x382   :  { %v6210_v15 = vmul.f32 %v9154_v28, %v5527_v9  ;;  %v5600_v16 = vpop.f32.mrb[70].mxu1  ;;  %v8689_v2 = vpop.f32.mrb[71].mxu0 }
 0x383   :  { %v6211_v23 = vmul.f32 %v9156_v53, %v5600_v16  ;;  %v8694_v4 = vpop.f32.mrb[71].mxu1 }
 0x384   :  { %8768 = vmatmul.mubr.msk.f32.vlgmr.msra.gmra.mrb[86].mxu0 %vm3658_vm2, %v6210_v15 }
 0x385   :  { %8773 = vmatmul.mubr.msk.f32.vlgmr.msra.gmra.mrb[86].mxu1 %vm3658_vm2, %v6211_v23  ;;  %8776 = vmatpush3.msk.msra.mxu0 %vm6231_vm4, %v10454_v25 }
 0x386   :  { %8777 = vmatprep.mubr.msk.f32.mxu0 %vm9198_vm0, %v9199_v11  ;;  %8781 = vmatpush3.msk.msra.mxu1 %vm6231_vm4, %v10462_v33  ;;  %v9164_v33 = vpop.eup %9163 }
 0x387   :  { %8782 = vmatprep.mubr.msk.f32.mxu1 %vm9198_vm0, %v9199_v11  ;;  %8785 = vmatprep.subr.mxu0 %v9199_v11  ;;  %v9166_v38 = vpop.eup %9165 }
 0x388   :  { %8790 = vmatprep.subr.mxu1 %v9199_v11  ;;  %v9168_v40 = vpop.eup %9167 }
 0x389   :  { %v5673_v51 = vpop.f32.mrb[72].mxu0 }
 0x38a   :  { %v6212_v20 = vmul.f32 %v9158_v47, %v5673_v51  ;;  %v5746_v22 = vpop.f32.mrb[72].mxu1  ;;  %v8699_v24 = vpop.f32.mrb[73].mxu0 }
 0x38b   :  { %v6213_v26 = vmul.f32 %v9160_v41, %v5746_v22  ;;  %v8704_v52 = vpop.f32.mrb[73].mxu1  ;;  %v7710_v41 = vld [vmem:[%s10618_s4] ss:$0 sm:$0xff]  ;;  %s9200_s4 = smov [#allocation2]  }
 0x38c   :  { %8778 = vmatmul.mubr.msk.f32.vlgmr.msra.gmra.mrb[88].mxu0 %vm3658_vm2, %v6212_v20  ;;  %s7467_s17 = sshll.u32 %s9200_s4, 4  ;;  %s7468_s17 = int_to_ptr.vmem [resolvable:$true] %s7467_s17 }
 0x38d   :  { %8783 = vmatmul.mubr.msk.f32.vlgmr.msra.gmra.mrb[88].mxu1 %vm3658_vm2, %v6213_v26  ;;  %8786 = vmatpush3.msk.msra.mxu0 %vm6231_vm4, %v10470_v56  ;;  %s9173_s18 = scalar_lea.vmem %s7468_s17, 256  ;;  %p9178_p1 = scmp.lt.s32.totalorder %s7468_s17, %s7468_s17 }
 0x38e   :  { %8787 = vmatprep.mubr.msk.f32.mxu0 %vm9198_vm0, %v9199_v11  ;;  %8791 = vmatpush3.msk.msra.mxu1 %vm6231_vm4, %v10480_v0  ;;  %v9170_v0 = vpop.eup %9169  ;;  %p9174_p0 = scmp.ne.s32.totalorder %s7468_s17, %s9173_s18  ;;  %p9179_p2 = scmp.lt.s32.totalorder %s9173_s18, %s9173_s18 }
 0x38f   :  { %8792 = vmatprep.mubr.msk.f32.mxu1 %vm9198_vm0, %v9199_v11  ;;  %8795 = vmatprep.subr.mxu0 %v9199_v11  ;;  %v9172_v13 = vpop.eup %9171 }
 0x390   :  { %8800 = vmatprep.subr.mxu1 %v9199_v11  ;;  %p9180_p3 = por %p9179_p2, %p9178_p1 }
 0x391   :  { %v5819_v25 = vpop.f32.mrb[74].mxu0 }
 0x392   :  { %v6214_v34 = vmul.f32 %v9162_v31, %v5819_v25  ;;  %v5892_v43 = vpop.f32.mrb[74].mxu1  ;;  %v8709_v36 = vpop.f32.mrb[75].mxu0  ;;  %p9181_p4 = pnand %p9180_p3, %p9174_p0 }
 0x393   :  { %v6215_v48 = vmul.f32 %v9164_v33, %v5892_v43  ;;  %v8714_v8 = vpop.f32.mrb[75].mxu1 }
 0x394   :  { %8788 = vmatmul.mubr.msk.f32.vlgmr.msra.gmra.mrb[90].mxu0 %vm3658_vm2, %v6214_v34 }
 0x395   :  { %8793 = vmatmul.mubr.msk.f32.vlgmr.msra.gmra.mrb[90].mxu1 %vm3658_vm2, %v6215_v48  ;;  %8796 = vmatpush3.msk.msra.mxu0 %vm6231_vm4, %v10492_v1 }
 0x396   :  { %8797 = vmatprep.mubr.msk.f32.mxu0 %vm9198_vm0, %v9199_v11  ;;  %8801 = vmatpush3.msk.msra.mxu1 %vm6231_vm4, %v10502_v32 }
 0x397   :  { %8802 = vmatprep.mubr.msk.f32.mxu1 %vm9198_vm0, %v9199_v11  ;;  %8805 = vmatprep.subr.mxu0 %v9199_v11 }
 0x398   :  { %8810 = vmatprep.subr.mxu1 %v9199_v11 }
 0x399   :  { %v5965_v56 = vpop.f32.mrb[76].mxu0 }
 0x39a   :  { %v6216_v58 = vmul.f32 %v9166_v38, %v5965_v56  ;;  %v6038_v60 = vpop.f32.mrb[76].mxu1  ;;  %v8719_v61 = vpop.f32.mrb[77].mxu0 }
 0x39b   :  { %v6217_v63 = vmul.f32 %v9168_v40, %v6038_v60  ;;  %v8724_v27 = vpop.f32.mrb[77].mxu1 }
 0x39c   :  { %8798 = vmatmul.mubr.msk.f32.vlgmr.msra.gmra.mrb[92].mxu0 %vm3658_vm2, %v6216_v58 }
 0x39d   :  { %8803 = vmatmul.mubr.msk.f32.vlgmr.msra.gmra.mrb[92].mxu1 %vm3658_vm2, %v6217_v63  ;;  %8806 = vmatpush3.msk.msra.mxu0 %vm6231_vm4, %v10514_v12 }
 0x39e   :  { %8807 = vmatprep.mubr.msk.f32.mxu0 %vm9198_vm0, %v9199_v11  ;;  %8811 = vmatpush3.msk.msra.mxu1 %vm6231_vm4, %v10519_v46 }
 0x39f   :  { %8812 = vmatprep.mubr.msk.f32.mxu1 %vm9198_vm0, %v9199_v11 }
 0x3a1   :  { %v6111_v29 = vpop.f32.mrb[78].mxu0 }
 0x3a2   :  { %v6218_v44 = vmul.f32 %v9170_v0, %v6111_v29  ;;  %v6184_v14 = vpop.f32.mrb[78].mxu1  ;;  %v8729_v1 = vpop.f32.mrb[79].mxu0 }
 0x3a3   :  { %v6219_v5 = vmul.f32 %v9172_v13, %v6184_v14  ;;  %v8734_v59 = vpop.f32.mrb[79].mxu1 }
 0x3a4   :  { %8808 = vmatmul.mubr.msk.f32.vlgmr.msra.gmra.mrb[94].mxu0 %vm3658_vm2, %v6218_v44 }
 0x3a5   :  { %8813 = vmatmul.mubr.msk.f32.vlgmr.msra.gmra.mrb[94].mxu1 %vm3658_vm2, %v6219_v5 }
 0x43f   :  { %v6301_v6 = vpop.f32.mrb[80].mxu0 }
 0x440   :  { %v8739_v7 = vpop.f32.mrb[81].mxu0  ;;  %v7421_v42 = vsel %vm111_vm1, %v6301_v6, 0.0 }
 0x443   :  { %v6377_v57 = vpop.f32.mrb[80].mxu1 }
 0x444   :  { %v7422_v32 = vsel %vm111_vm1, %v6377_v57, 0.0  ;;  %v8744_v11 = vpop.f32.mrb[81].mxu1 }
 0x445   :  { %v7423_v35 = vadd.f32 %v7422_v32, %v7421_v42 }
 0x447   :  { %v6453_v17 = vpop.f32.mrb[82].mxu0 }
 0x448   :  { %v7424_v19 = vsel %vm111_vm1, %v6453_v17, 0.0  ;;  %v8749_v10 = vpop.f32.mrb[83].mxu0 }
 0x449   :  { %v7425_v50 = vadd.f32 %v7424_v19, %v7423_v35 }
 0x44b   :  { %v6529_v62 = vpop.f32.mrb[82].mxu1 }
 0x44c   :  { %v7426_v12 = vsel %vm111_vm1, %v6529_v62, 0.0  ;;  %v8754_v21 = vpop.f32.mrb[83].mxu1 }
 0x44d   :  { %v7427_v37 = vadd.f32 %v7426_v12, %v7425_v50 }
 0x44f   :  { %v6605_v46 = vpop.f32.mrb[84].mxu0 }
 0x450   :  { %v7428_v39 = vsel %vm111_vm1, %v6605_v46, 0.0  ;;  %v6681_v18 = vpop.f32.mrb[84].mxu1  ;;  %v8759_v28 = vpop.f32.mrb[85].mxu0 }
 0x451   :  { %v7429_v9 = vadd.f32 %v7428_v39, %v7427_v37  ;;  %v8764_v53 = vpop.f32.mrb[85].mxu1  ;;  %v7430_v15 = vsel %vm111_vm1, %v6681_v18, 0.0 }
 0x453   :  { %v7431_v16 = vadd.f32 %v7430_v15, %v7429_v9 }
 0x457   :  { %v6757_v2 = vpop.f32.mrb[86].mxu0 }
 0x458   :  { %v7432_v23 = vsel %vm111_vm1, %v6757_v2, 0.0  ;;  %v6833_v4 = vpop.f32.mrb[86].mxu1  ;;  %v8769_v45 = vpop.f32.mrb[87].mxu0 }
 0x459   :  { %v7433_v55 = vadd.f32 %v7432_v23, %v7431_v16  ;;  %v8774_v47 = vpop.f32.mrb[87].mxu1  ;;  %v7434_v51 = vsel %vm111_vm1, %v6833_v4, 0.0 }
 0x45b   :  { %v7435_v20 = vadd.f32 %v7434_v51, %v7433_v55 }
 0x45d   :  { %v7458_v22 = vadd.f32 %v7710_v41, %v7435_v20 }
 0x45f   :  { %7460 = vst.msk [vmem:[#allocation2] sm:$0xff] %vm111_vm1, %v7458_v22  ;;  %v6906_v24 = vpop.f32.mrb[88].mxu0 }
 0x460   :  { %v7436_v26 = vsel %vm111_vm1, %v6906_v24, 0.0  ;;  %v6979_v52 = vpop.f32.mrb[88].mxu1  ;;  %v8779_v54 = vpop.f32.mrb[89].mxu0 }
 0x461   :  { %v7437_v30 = vsel %vm111_vm1, %v6979_v52, 0.0  ;;  %v8784_v31 = vpop.f32.mrb[89].mxu1 }
 0x462   :  { %v7438_v25 = vadd.f32 %v7437_v30, %v7436_v26 }
 0x467   :  { %v7052_v33 = vpop.f32.mrb[90].mxu0 }
 0x468   :  { %v7439_v34 = vsel %vm111_vm1, %v7052_v33, 0.0  ;;  %v7125_v43 = vpop.f32.mrb[90].mxu1  ;;  %v8789_v36 = vpop.f32.mrb[91].mxu0 }
 0x469   :  { %v7440_v48 = vadd.f32 %v7439_v34, %v7438_v25  ;;  %v8794_v8 = vpop.f32.mrb[91].mxu1  ;;  %v7441_v3 = vsel %vm111_vm1, %v7125_v43, 0.0 }
 0x46b   :  { %v7442_v49 = vadd.f32 %v7441_v3, %v7440_v48 }
 0x46f   :  { %v7198_v38 = vpop.f32.mrb[92].mxu0 }
 0x470   :  { %v7443_v56 = vsel %vm111_vm1, %v7198_v38, 0.0  ;;  %v7271_v40 = vpop.f32.mrb[92].mxu1  ;;  %v8799_v58 = vpop.f32.mrb[93].mxu0 }
 0x471   :  { %v7444_v60 = vadd.f32 %v7443_v56, %v7442_v49  ;;  %v8804_v61 = vpop.f32.mrb[93].mxu1  ;;  %v7445_v63 = vsel %vm111_vm1, %v7271_v40, 0.0 }
 0x473   :  { %v7446_v27 = vadd.f32 %v7445_v63, %v7444_v60 }
 0x477   :  { %v7344_v0 = vpop.f32.mrb[94].mxu0 }
 0x478   :  { %v7447_v29 = vsel %vm111_vm1, %v7344_v0, 0.0  ;;  %v7417_v13 = vpop.f32.mrb[94].mxu1  ;;  %v8809_v44 = vpop.f32.mrb[95].mxu0 }
 0x479   :  { %v7448_v14 = vadd.f32 %v7447_v29, %v7446_v27  ;;  %v8814_v1 = vpop.f32.mrb[95].mxu1  ;;  %v7449_v5 = vsel %vm111_vm1, %v7417_v13, 0.0 }
 0x47b   :  { %v7450_v59 = vadd.f32 %v7449_v5, %v7448_v14 }
 0x47d   :  { %v7459_v6 = vadd.f32 %v7710_v41, %v7450_v59 }
 0x47f   :  { %7461 = vst.msk [vmem:[#allocation2 + $0x8] sm:$0xff] %vm111_vm1, %v7459_v6 }
 0x480   :  { %9184 = shalt.err (!%p9181_p4)
}
 0x481   :  { %s9185_s21 = scalar_lea.hbm %s10619_s5, 256 }
 0x482   :  { %p9186_p5 = scmp.ne.s32.totalorder %s10619_s5, %s9185_s21  ;;  %p9189_p6 = scmp.lt.u32.totalorder %s9185_s21, %s10619_s5 }
 0x484   :  { %p9191_p7 = pnand %p9189_p6, %p9186_p5 }
 0x486   :  { %9194 = shalt.err (!%p9191_p7)
}
 0x487   :  { %s9201_s26 = smov 128   ;;  %s9202_s27 = smov 8  }
 0x488   :  { %7473 = dma.vmem_to_hbm [thread:$0]  %s7468_s17, 256, %s10619_s5, [#allocation3], %s9201_s26, %s9201_s26, %s9202_s27  }
 0x489   :  { %9195 = dma.done.wait [#allocation3], 256  }
 0x48a   :  { %9196 = vsyncadd [#allocation3], 4294967040 }
 0x48b   :  { %7477 = vsyncpa [#allocation3], 1 }

</bundles_post_ra>
